<compile_context>
chip_gen: v6e
topology: v6e:2x2x1
jax: 0.10.0
libtpu: 0.0.40
codegen_flags: <defaults>
</compile_context>

<pallas_src>
import math
import functools

import jax
import jax.numpy as jnp
from jax.experimental import pallas as pl
from jax.experimental.pallas import tpu as pltpu


# -----------------------------------------------------------------------------
# Helpers
# -----------------------------------------------------------------------------
def _layernorm(x, g, b, eps=1e-5):
    # PyTorch LayerNorm: biased variance, eps=1e-5, elementwise affine. f32 math.
    mu = jnp.mean(x, axis=-1, keepdims=True)
    xc = x - mu
    var = jnp.mean(xc * xc, axis=-1, keepdims=True)
    return xc * jax.lax.rsqrt(var + eps) * g + b


# -----------------------------------------------------------------------------
# Fused whole-network Pallas kernel (one grid step == one layer of one batch block)
# -----------------------------------------------------------------------------
def _fused_net_kernel(h_ref, ctx_ref, wq_ref, wkv_ref, wo_ref, w1_ref, w2_ref,
                      misc_ref, pe_ref, o_ref, h_s, ctx_s, *,
                      nheads, head_dim, hid, inner, qlen, klen, bblk):
    f32 = jnp.float32
    H, D, M, K, Bb = nheads, head_dim, qlen, klen, bblk
    HD = H * D
    l = pl.program_id(1)

    # Layer 0: load activations into the persistent VMEM scratch (state carried
    # across the "arbitrary" layer axis).
    @pl.when(l == 0)
    def _():
        h_s[...] = h_ref[...].astype(f32)
        ctx_s[...] = ctx_ref[...].astype(f32)

    cdt = wq_ref.dtype   # MXU operand dtype (bf16 for perf, f32 for checking)

    # Additive causal mask built in-registers — no HBM traffic, hides under MXU.
    row = jax.lax.broadcasted_iota(jnp.int32, (M, K), 0)
    col = jax.lax.broadcasted_iota(jnp.int32, (M, K), 1)
    madd = jnp.where(col <= (K - M) + row, 0.0, -1e30).astype(f32)

    wq = wq_ref[0]        # (hid, HD)     softmax scale pre-folded
    wkv = wkv_ref[0]      # (hid, 2*HD)   [wk | wv] fused
    wo = wo_ref[0]        # (HD, hid)
    w1 = w1_ref[0]        # (hid, inner)
    w2 = w2_ref[0]        # (inner, hid)
    misc = misc_ref[0]    # (6, max(hid, inner))  packed small params, f32
    peE = pe_ref[...]     # (D, K+M-1)    key_pe[:, -K:] zero-padded by M-1 cols

    ln1g, ln1b = misc[0:1, :hid], misc[1:2, :hid]
    ln2g, ln2b = misc[2:3, :hid], misc[3:4, :hid]
    bff2, bff1 = misc[4:5, :hid], misc[5:6, :inner]

    hf = h_s[...]         # (Bb*M, hid) f32
    cf = ctx_s[...]       # (Bb*K, hid) f32

    # Fused projections: all batch rows in one matmul (fills MXU rows), bf16 ops,
    # f32 accumulation.
    q = jnp.dot(hf.astype(cdt), wq, preferred_element_type=f32)     # (Bb*M, HD)
    kv = jnp.dot(cf.astype(cdt), wkv, preferred_element_type=f32)   # (Bb*K, 2HD)
    q_c, kv_c = q.astype(cdt), kv.astype(cdt)

    attn_rows = []
    for b in range(Bb):
        acc = jnp.zeros((M, hid), f32)
        for hh in range(H):
            q_h = q_c[b * M:(b + 1) * M, hh * D:(hh + 1) * D]              # (M, D)
            k_h = kv_c[b * K:(b + 1) * K, hh * D:(hh + 1) * D]             # (K, D)
            v_h = kv_c[b * K:(b + 1) * K, HD + hh * D:HD + (hh + 1) * D]   # (K, D)

            # content scores
            s = jax.lax.dot_general(q_h, k_h, (((1,), (1,)), ((), ())),
                                    preferred_element_type=f32)            # (M, K)

            # relative-position scores: q_h @ key_pe, then the reference's
            # skew()[..., -K-1:-1]: row i shifted left by (M-1-i); the zero pad of
            # peE reproduces the clip, so no giant pre-skewed constant is needed.
            qpe = jnp.dot(q_h, peE, preferred_element_type=f32)            # (M, K+M-1)
            pos = jnp.concatenate(
                [qpe[i:i + 1, (M - 1 - i):(M - 1 - i) + K] for i in range(M)],
                axis=0)                                                    # (M, K)

            logits = s + pos + madd            # 1/sqrt(D) already folded into wq
            mx = jnp.max(logits, axis=-1, keepdims=True)
            e = jnp.exp(logits - mx)
            p = e / jnp.sum(e, axis=-1, keepdims=True)         # exact division
            o_h = jnp.dot(p.astype(cdt), v_h, preferred_element_type=f32)  # (M, D)

            # accumulate the output projection per head — no head concat/relayout
            acc = acc + jnp.dot(o_h.astype(cdt), wo[hh * D:(hh + 1) * D, :],
                                preferred_element_type=f32)                # (M, hid)
        attn_rows.append(acc)
    attn = jnp.concatenate(attn_rows, axis=0)                              # (Bb*M, hid)

    # residual + LayerNorm + FFN + residual + LayerNorm (f32 elementwise math)
    h2 = _layernorm(hf + attn, ln1g, ln1b)
    f1 = jnp.maximum(
        jnp.dot(h2.astype(cdt), w1, preferred_element_type=f32) + bff1, 0.0)
    f2 = jnp.dot(f1.astype(cdt), w2, preferred_element_type=f32) + bff2
    out = _layernorm(h2 + f2, ln2g, ln2b)                                  # (Bb*M, hid)

    # carry state to the next layer step: h <- out, context tail <- out (in VMEM)
    h_s[...] = out
    for b in range(Bb):
        ctx_s[b * K + (K - M):(b + 1) * K, :] = out[b * M:(b + 1) * M, :]

    @pl.when(l == pl.num_programs(1) - 1)
    def _():
        o_ref[...] = out.astype(o_ref.dtype)


# -----------------------------------------------------------------------------
# Wrapper: parameter packing + pallas_call
# -----------------------------------------------------------------------------
def transformer_mod_forward(h, context, params, cfg, *,
                            compute_dtype=jnp.bfloat16, batch_block=None):
    B, M, hid = h.shape
    K = context.shape[1]
    H, D = cfg["nheads"], cfg["head_dim"]
    HD = H * D
    inner = cfg["inner_hid_sz"]
    L = cfg["nlayers"]
    assert M <= K <= cfg["attn_lim"]
    Bb = B if batch_block is None else batch_block
    assert B % Bb == 0

    cdt = compute_dtype
    scale = 1.0 / math.sqrt(D)
    layers = params["layers"]

    # Stacked per-layer weights (layer axis becomes a grid axis -> auto prefetch),
    # scale folded into wq, k|v fused, everything MXU-bound shipped in compute dtype.
    wq_all = jnp.stack([lp["wq"] * scale for lp in layers]).astype(cdt)      # (L,hid,HD)
    wkv_all = jnp.stack([jnp.concatenate([lp["wk"], lp["wv"]], axis=1)
                         for lp in layers]).astype(cdt)                      # (L,hid,2HD)
    wo_all = jnp.stack([lp["wo"] for lp in layers]).astype(cdt)              # (L,HD,hid)
    w1_all = jnp.stack([lp["w_ff1"] for lp in layers]).astype(cdt)           # (L,hid,inner)
    w2_all = jnp.stack([lp["w_ff2"] for lp in layers]).astype(cdt)           # (L,inner,hid)

    # Pack the small per-layer vectors into one input (cuts DMA/arg count).
    Wp = max(hid, inner)
    pad1 = lambda v: jnp.pad(v, (0, Wp - v.shape[0]))
    misc_all = jnp.stack([
        jnp.stack([pad1(lp["ln1_g"]), pad1(lp["ln1_b"]),
                   pad1(lp["ln2_g"]), pad1(lp["ln2_b"]),
                   pad1(lp["b_ff2"]), pad1(lp["b_ff1"])])
        for lp in layers]).astype(jnp.float32)                               # (L,6,Wp)

    # key_pe (shared across layers): last K columns, zero-padded by M-1 so the
    # in-kernel per-row skew slice never reads out of bounds.
    pe = params["key_pe"][0, :, -K:]                                         # (D, K)
    peE = jnp.pad(pe, ((0, 0), (0, M - 1))).astype(cdt)                      # (D, K+M-1)

    h2d = h.reshape(B * M, hid)
    c2d = context.reshape(B * K, hid)

    kernel = functools.partial(_fused_net_kernel, nheads=H, head_dim=D, hid=hid,
                               inner=inner, qlen=M, klen=K, bblk=Bb)

    out = pl.pallas_call(
        kernel,
        out_shape=jax.ShapeDtypeStruct((B * M, hid), h.dtype),
        grid=(B // Bb, L),
        in_specs=[
            pl.BlockSpec((Bb * M, hid), lambda b, l: (b, 0)),        # h
            pl.BlockSpec((Bb * K, hid), lambda b, l: (b, 0)),        # context
            pl.BlockSpec((1, hid, HD), lambda b, l: (l, 0, 0)),      # wq (scaled)
            pl.BlockSpec((1, hid, 2 * HD), lambda b, l: (l, 0, 0)),  # wk|wv
            pl.BlockSpec((1, HD, hid), lambda b, l: (l, 0, 0)),      # wo
            pl.BlockSpec((1, hid, inner), lambda b, l: (l, 0, 0)),   # ff1
            pl.BlockSpec((1, inner, hid), lambda b, l: (l, 0, 0)),   # ff2
            pl.BlockSpec((1, 6, Wp), lambda b, l: (l, 0, 0)),        # packed small
            pl.BlockSpec((D, K + M - 1), lambda b, l: (0, 0)),       # key_pe (padded)
        ],
        out_specs=pl.BlockSpec((Bb * M, hid), lambda b, l: (b, 0)),
        scratch_shapes=[pltpu.VMEM((Bb * M, hid), jnp.float32),      # h state
                        pltpu.VMEM((Bb * K, hid), jnp.float32)],     # context state
        compiler_params=pltpu.CompilerParams(
            dimension_semantics=("parallel", "arbitrary"),
            # generation-specific when scaling up (~48-56 MiB v7x, ~100 MiB v5e/v6e)
            vmem_limit_bytes=48 * 1024 * 1024),
    )(h2d, c2d, wq_all, wkv_all, wo_all, w1_all, w2_all, misc_all, peE)

    return out.reshape(B, M, hid)


# -----------------------------------------------------------------------------
# Pure-JAX reference (faithful port, PyTorch-style pad/flatten skew).
# `cast` lets us build a matched-precision (bf16-operand) reference.
# -----------------------------------------------------------------------------
def reference_forward(h, context, params, cfg, cast=None):
    if cast is None:
        cast = lambda x: x
    H, D = cfg["nheads"], cfg["head_dim"]
    scale = 1.0 / math.sqrt(D)
    f32 = jnp.float32

    def mm(a, b):
        return jnp.matmul(cast(a), cast(b), preferred_element_type=f32)

    def ln(x, g, b):
        mu = x.mean(-1, keepdims=True)
        xc = x - mu
        v = (xc * xc).mean(-1, keepdims=True)
        return xc / jnp.sqrt(v + 1e-5) * g + b

    key_pe = params["key_pe"]
    for lp in params["layers"]:
        B, M, hid = h.shape
        K = context.shape[1]
        q = mm(h, lp["wq"]).reshape(B, M, H, D).transpose(0, 2, 1, 3)
        k = mm(context, lp["wk"]).reshape(B, K, H, D).transpose(0, 2, 1, 3)
        v = mm(context, lp["wv"]).reshape(B, K, H, D).transpose(0, 2, 1, 3)
        pe = key_pe[0, :, -K:]
        s = jnp.einsum("bhmd,bhkd->bhmk", cast(q), cast(k),
                       preferred_element_type=f32)
        qpe = jnp.einsum("bhmd,dk->bhmk", cast(q), cast(pe),
                         preferred_element_type=f32)
        # skew(X, 0): pad M+1, flatten, drop last M, reshape; then slice [-K-1:-1]
        x = qpe.reshape(B * H, M, K)
        x = jnp.pad(x, ((0, 0), (0, 0), (0, M + 1)))
        x = x.reshape(B * H, M * (K + M + 1))[:, :-M].reshape(B * H, M, K + M)
        pos = x[:, :, -K - 1:-1].reshape(B, H, M, K)
        i = jnp.arange(M)[:, None]
        j = jnp.arange(K)[None, :]
        mask = jnp.where(j <= (K - M) + i, 0.0, -jnp.inf)
        logits = (s + pos + mask) * scale
        p = jax.nn.softmax(logits, axis=-1)
        o = jnp.einsum("bhmk,bhkd->bhmd", cast(p), cast(v),
                       preferred_element_type=f32)
        o = o.transpose(0, 2, 1, 3).reshape(B, M, H * D)
        o = mm(o, lp["wo"])
        h2 = ln(h + o, lp["ln1_g"], lp["ln1_b"])
        f1 = jnp.maximum(mm(h2, lp["w_ff1"]) + lp["b_ff1"], 0.0)
        f = mm(f1, lp["w_ff2"]) + lp["b_ff2"]
        h = ln(h2 + f, lp["ln2_g"], lp["ln2_b"])
        context = jax.lax.dynamic_update_slice(context, h, (0, K - M, 0))
    return h


# -----------------------------------------------------------------------------
# Deterministic synthetic parameters (shapes from the PyTorch module)
# -----------------------------------------------------------------------------
def init_params(key, cfg):
    hid, H, D = cfg["hid_sz"], cfg["nheads"], cfg["head_dim"]
    inner, nl, attn_lim = cfg["inner_hid_sz"], cfg["nlayers"], cfg["attn_lim"]

    key, kpe = jax.random.split(key)
    params = {
        # shared across layers (TransformerMod ties key_pe of all layers)
        "key_pe": jax.random.normal(kpe, (1, D, attn_lim), jnp.float32) / math.sqrt(D),
        "layers": [],
    }
    for _ in range(nl):
        key, *ks = jax.random.split(key, 8)
        params["layers"].append({
            "wq": jax.random.normal(ks[0], (hid, H * D), jnp.float32) / math.sqrt(hid),
            "wk": jax.random.normal(ks[1], (hid, H * D), jnp.float32) / math.sqrt(hid),
            "wv": jax.random.normal(ks[2], (hid, H * D), jnp.float32) / math.sqrt(hid),
            "wo": jax.random.normal(ks[3], (H * D, hid), jnp.float32) / math.sqrt(H * D),
            "ln1_g": jnp.ones((hid,), jnp.float32),
            "ln1_b": jnp.zeros((hid,), jnp.float32),
            "ln2_g": jnp.ones((hid,), jnp.float32),
            "ln2_b": jnp.zeros((hid,), jnp.float32),
            "w_ff1": jax.random.normal(ks[4], (hid, inner), jnp.float32) / math.sqrt(hid),
            "b_ff1": jax.random.normal(ks[5], (inner,), jnp.float32) * 0.01,
            "w_ff2": jax.random.normal(ks[6], (inner, hid), jnp.float32) / math.sqrt(inner),
            "b_ff2": jnp.zeros((hid,), jnp.float32),
        })
    return params


# -----------------------------------------------------------------------------
if __name__ == "__main__":
    cfg = dict(
        hid_sz=32, nheads=4, head_dim=8, inner_hid_sz=64,
        nlayers=2, attn_lim=16, pre_norm=False, dropout=0.0,
    )
    B, M, K = 2, 8, 16  # batch, query length, context length

    root = jax.random.PRNGKey(0)
    kp, kh, kc = jax.random.split(root, 3)
    params = init_params(kp, cfg)

    h = jax.random.normal(kh, (B, M, cfg["hid_sz"]), jnp.float32)
    context = jax.random.normal(kc, (B, K, cfg["hid_sz"]), jnp.float32)

    fwd_bf16 = jax.jit(functools.partial(transformer_mod_forward, cfg=cfg,
                                         compute_dtype=jnp.bfloat16))
    fwd_f32 = jax.jit(functools.partial(transformer_mod_forward, cfg=cfg,
                                        compute_dtype=jnp.float32))

    out = jax.block_until_ready(fwd_bf16(h, context, params))       # perf config
    out_f32 = jax.block_until_ready(fwd_f32(h, context, params))    # checking config

    assert out.shape == (B, M, cfg["hid_sz"])
    assert bool(jnp.all(jnp.isfinite(out)))

    # Correctness: f32-operand kernel vs f32 reference (catches any logic error),
    # bf16-operand kernel vs matched-precision (bf16-operand) reference.
    ref_f32 = reference_forward(h, context, params, cfg)
    ref_bf16 = reference_forward(h, context, params, cfg,
                                 cast=lambda x: x.astype(jnp.bfloat16))

    err_f32 = float(jnp.max(jnp.abs(out_f32 - ref_f32)))
    err_bf16 = float(jnp.max(jnp.abs(out - ref_bf16)))
    assert bool(jnp.allclose(out_f32, ref_f32, atol=5e-2, rtol=5e-2)), err_f32
    assert bool(jnp.allclose(out, ref_bf16, atol=5e-2, rtol=5e-2)), err_bf16

    print("KERNEL_OK")
</pallas_src>

<mosaic_0001>
module attributes {stable_mosaic.version = 11 : i64} {
  func.func @_fused_net_kernel(%arg0: i32, %arg1: i32, %arg2: memref<16x32xf32, #tpu.memory_space<vmem>>, %arg3: memref<32x32xf32, #tpu.memory_space<vmem>>, %arg4: memref<1x32x32xbf16, #tpu.memory_space<vmem>>, %arg5: memref<1x32x64xbf16, #tpu.memory_space<vmem>>, %arg6: memref<1x32x32xbf16, #tpu.memory_space<vmem>>, %arg7: memref<1x32x64xbf16, #tpu.memory_space<vmem>>, %arg8: memref<1x64x32xbf16, #tpu.memory_space<vmem>>, %arg9: memref<1x6x64xf32, #tpu.memory_space<vmem>>, %arg10: memref<8x23xbf16, #tpu.memory_space<vmem>>, %arg11: memref<16x32xf32, #tpu.memory_space<vmem>>, %arg12: memref<16x32xf32, #tpu.memory_space<vmem>>, %arg13: memref<32x32xf32, #tpu.memory_space<vmem>>) attributes {dimension_semantics = [#tpu.dimension_semantics<parallel>, #tpu.dimension_semantics<arbitrary>], iteration_bounds = array<i64: 1, 2>, scalar_prefetch = 0 : i64, scratch_operands = 2 : i64, tpu.core_type = #tpu.core_type<tc>, window_params = [{transform_indices = @transform_0, window_bounds = array<i64: 16, 32>}, {transform_indices = @transform_1, window_bounds = array<i64: 32, 32>}, {transform_indices = @transform_2, window_bounds = array<i64: 1, 32, 32>}, {transform_indices = @transform_3, window_bounds = array<i64: 1, 32, 64>}, {transform_indices = @transform_4, window_bounds = array<i64: 1, 32, 32>}, {transform_indices = @transform_5, window_bounds = array<i64: 1, 32, 64>}, {transform_indices = @transform_6, window_bounds = array<i64: 1, 64, 32>}, {transform_indices = @transform_7, window_bounds = array<i64: 1, 6, 64>}, {pipeline_mode = #tpu.pipeline_mode<synchronous>, transform_indices = @transform_8, window_bounds = array<i64: 8, 23>}, {transform_indices = @transform_9, window_bounds = array<i64: 16, 32>}]} {
    %c0_i32 = arith.constant 0 : i32
    %0 = arith.cmpi eq, %arg1, %c0_i32 : i32
    %1 = arith.extui %0 : i1 to i32
    %c0_i32_0 = arith.constant 0 : i32
    %2 = arith.cmpi ne, %1, %c0_i32_0 : i32
    scf.if %2 {
      %c0_95 = arith.constant 0 : index
      %c0_96 = arith.constant 0 : index
      %349 = vector.load %arg2[%c0_95, %c0_96] : memref<16x32xf32, #tpu.memory_space<vmem>>, vector<16x32xf32>
      %c0_97 = arith.constant 0 : index
      %c0_98 = arith.constant 0 : index
      %350 = vector.load %arg12[%c0_97, %c0_98] : memref<16x32xf32, #tpu.memory_space<vmem>>, vector<16x32xf32>
      tpu.vector_store %arg12[%c0_97, %c0_98], %349 {strides = array<i32>} : memref<16x32xf32, #tpu.memory_space<vmem>>, vector<16x32xf32>,
      %c0_99 = arith.constant 0 : index
      %c0_100 = arith.constant 0 : index
      %351 = vector.load %arg3[%c0_99, %c0_100] : memref<32x32xf32, #tpu.memory_space<vmem>>, vector<32x32xf32>
      %c0_101 = arith.constant 0 : index
      %c0_102 = arith.constant 0 : index
      %352 = vector.load %arg13[%c0_101, %c0_102] : memref<32x32xf32, #tpu.memory_space<vmem>>, vector<32x32xf32>
      tpu.vector_store %arg13[%c0_101, %c0_102], %351 {strides = array<i32>} : memref<32x32xf32, #tpu.memory_space<vmem>>, vector<32x32xf32>,
    } else {
    }
    %3 = tpu.iota {dimensions = array<i32: 0>} : vector<8x16xi32>
    %4 = tpu.iota {dimensions = array<i32: 1>} : vector<8x16xi32>
    %c8_i32 = arith.constant 8 : i32
    %5 = vector.broadcast %c8_i32 : i32 to vector<8x16xi32>
    %6 = arith.addi %5, %3 : vector<8x16xi32>
    %7 = arith.cmpi sle, %4, %6 : vector<8x16xi32>
    %cst = arith.constant 0.000000e+00 : f32
    %cst_1 = arith.constant -1.000000e+30 : f32
    %8 = vector.broadcast %cst : f32 to vector<8x16xf32>
    %9 = vector.broadcast %cst_1 : f32 to vector<8x16xf32>
    %10 = arith.select %7, %8, %9 : vector<8x16xi1>, vector<8x16xf32>
    %c0 = arith.constant 0 : index
    %c0_2 = arith.constant 0 : index
    %c0_3 = arith.constant 0 : index
    %11 = vector.load %arg4[%c0, %c0_2, %c0_3] : memref<1x32x32xbf16, #tpu.memory_space<vmem>>, vector<1x32x32xbf16>
    %12 = vector.shape_cast %11 : vector<1x32x32xbf16> to vector<32x32xbf16>
    %c0_4 = arith.constant 0 : index
    %c0_5 = arith.constant 0 : index
    %c0_6 = arith.constant 0 : index
    %13 = vector.load %arg5[%c0_4, %c0_5, %c0_6] : memref<1x32x64xbf16, #tpu.memory_space<vmem>>, vector<1x32x64xbf16>
    %14 = vector.shape_cast %13 : vector<1x32x64xbf16> to vector<32x64xbf16>
    %c0_7 = arith.constant 0 : index
    %c0_8 = arith.constant 0 : index
    %c0_9 = arith.constant 0 : index
    %15 = vector.load %arg6[%c0_7, %c0_8, %c0_9] : memref<1x32x32xbf16, #tpu.memory_space<vmem>>, vector<1x32x32xbf16>
    %16 = vector.shape_cast %15 : vector<1x32x32xbf16> to vector<32x32xbf16>
    %c0_10 = arith.constant 0 : index
    %c0_11 = arith.constant 0 : index
    %c0_12 = arith.constant 0 : index
    %17 = vector.load %arg7[%c0_10, %c0_11, %c0_12] : memref<1x32x64xbf16, #tpu.memory_space<vmem>>, vector<1x32x64xbf16>
    %18 = vector.shape_cast %17 : vector<1x32x64xbf16> to vector<32x64xbf16>
    %c0_13 = arith.constant 0 : index
    %c0_14 = arith.constant 0 : index
    %c0_15 = arith.constant 0 : index
    %19 = vector.load %arg8[%c0_13, %c0_14, %c0_15] : memref<1x64x32xbf16, #tpu.memory_space<vmem>>, vector<1x64x32xbf16>
    %20 = vector.shape_cast %19 : vector<1x64x32xbf16> to vector<64x32xbf16>
    %c0_16 = arith.constant 0 : index
    %c0_17 = arith.constant 0 : index
    %c0_18 = arith.constant 0 : index
    %21 = vector.load %arg9[%c0_16, %c0_17, %c0_18] : memref<1x6x64xf32, #tpu.memory_space<vmem>>, vector<1x6x64xf32>
    %22 = vector.shape_cast %21 : vector<1x6x64xf32> to vector<6x64xf32>
    %c0_19 = arith.constant 0 : index
    %c0_20 = arith.constant 0 : index
    %23 = vector.load %arg10[%c0_19, %c0_20] : memref<8x23xbf16, #tpu.memory_space<vmem>>, vector<8x23xbf16>
    %24 = vector.extract_strided_slice %22 {offsets = [0, 0], sizes = [1, 32], strides = [1, 1]} : vector<6x64xf32> to vector<1x32xf32>
    %25 = vector.extract_strided_slice %22 {offsets = [1, 0], sizes = [1, 32], strides = [1, 1]} : vector<6x64xf32> to vector<1x32xf32>
    %26 = vector.extract_strided_slice %22 {offsets = [2, 0], sizes = [1, 32], strides = [1, 1]} : vector<6x64xf32> to vector<1x32xf32>
    %27 = vector.extract_strided_slice %22 {offsets = [3, 0], sizes = [1, 32], strides = [1, 1]} : vector<6x64xf32> to vector<1x32xf32>
    %28 = vector.extract_strided_slice %22 {offsets = [4, 0], sizes = [1, 32], strides = [1, 1]} : vector<6x64xf32> to vector<1x32xf32>
    %29 = vector.extract_strided_slice %22 {offsets = [5, 0], sizes = [1, 64], strides = [1, 1]} : vector<6x64xf32> to vector<1x64xf32>
    %c0_21 = arith.constant 0 : index
    %c0_22 = arith.constant 0 : index
    %30 = vector.load %arg12[%c0_21, %c0_22] : memref<16x32xf32, #tpu.memory_space<vmem>>, vector<16x32xf32>
    %c0_23 = arith.constant 0 : index
    %c0_24 = arith.constant 0 : index
    %31 = vector.load %arg13[%c0_23, %c0_24] : memref<32x32xf32, #tpu.memory_space<vmem>>, vector<32x32xf32>
    %32 = arith.truncf %30 : vector<16x32xf32> to vector<16x32xbf16>
    %cst_25 = arith.constant dense<0.000000e+00> : vector<16x32xf32>
    %33 = tpu.matmul %32, %12, %cst_25 {dimension_numbers = #tpu.dot_dimension_numbers<[1], [0], [0], [1], [0, 0, 1, 1], [], []>} : vector<16x32xbf16>, vector<32x32xbf16>, vector<16x32xf32> -> vector<16x32xf32>
    %34 = arith.truncf %31 : vector<32x32xf32> to vector<32x32xbf16>
    %cst_26 = arith.constant dense<0.000000e+00> : vector<32x64xf32>
    %35 = tpu.matmul %34, %14, %cst_26 {dimension_numbers = #tpu.dot_dimension_numbers<[1], [0], [0], [1], [0, 0, 1, 1], [], []>} : vector<32x32xbf16>, vector<32x64xbf16>, vector<32x64xf32> -> vector<32x64xf32>
    %36 = arith.truncf %33 : vector<16x32xf32> to vector<16x32xbf16>
    %37 = arith.truncf %35 : vector<32x64xf32> to vector<32x64xbf16>
    %cst_27 = arith.constant 0.000000e+00 : f32
    %38 = vector.broadcast %cst_27 : f32 to vector<8x32xf32>
    %39 = vector.extract_strided_slice %36 {offsets = [0, 0], sizes = [8, 8], strides = [1, 1]} : vector<16x32xbf16> to vector<8x8xbf16>
    %40 = vector.extract_strided_slice %37 {offsets = [0, 0], sizes = [16, 8], strides = [1, 1]} : vector<32x64xbf16> to vector<16x8xbf16>
    %41 = vector.extract_strided_slice %37 {offsets = [0, 32], sizes = [16, 8], strides = [1, 1]} : vector<32x64xbf16> to vector<16x8xbf16>
    %cst_28 = arith.constant dense<0.000000e+00> : vector<8x16xf32>
    %42 = tpu.matmul %39, %40, %cst_28 {dimension_numbers = #tpu.dot_dimension_numbers<[1], [1], [0], [0], [0, 0, 1, 0], [], []>} : vector<8x8xbf16>, vector<16x8xbf16>, vector<8x16xf32> -> vector<8x16xf32>
    %cst_29 = arith.constant dense<0.000000e+00> : vector<8x23xf32>
    %43 = tpu.matmul %39, %23, %cst_29 {dimension_numbers = #tpu.dot_dimension_numbers<[1], [0], [0], [1], [0, 0, 1, 1], [], []>} : vector<8x8xbf16>, vector<8x23xbf16>, vector<8x23xf32> -> vector<8x23xf32>
    %44 = vector.extract_strided_slice %43 {offsets = [0, 7], sizes = [1, 16], strides = [1, 1]} : vector<8x23xf32> to vector<1x16xf32>
    %45 = vector.extract_strided_slice %43 {offsets = [1, 6], sizes = [1, 16], strides = [1, 1]} : vector<8x23xf32> to vector<1x16xf32>
    %46 = vector.extract_strided_slice %43 {offsets = [2, 5], sizes = [1, 16], strides = [1, 1]} : vector<8x23xf32> to vector<1x16xf32>
    %47 = vector.extract_strided_slice %43 {offsets = [3, 4], sizes = [1, 16], strides = [1, 1]} : vector<8x23xf32> to vector<1x16xf32>
    %48 = vector.extract_strided_slice %43 {offsets = [4, 3], sizes = [1, 16], strides = [1, 1]} : vector<8x23xf32> to vector<1x16xf32>
    %49 = vector.extract_strided_slice %43 {offsets = [5, 2], sizes = [1, 16], strides = [1, 1]} : vector<8x23xf32> to vector<1x16xf32>
    %50 = vector.extract_strided_slice %43 {offsets = [6, 1], sizes = [1, 16], strides = [1, 1]} : vector<8x23xf32> to vector<1x16xf32>
    %51 = vector.extract_strided_slice %43 {offsets = [7, 0], sizes = [1, 16], strides = [1, 1]} : vector<8x23xf32> to vector<1x16xf32>
    %52 = tpu.concatenate %44, %45, %46, %47, %48, %49, %50, %51 in 0 : vector<1x16xf32>, vector<1x16xf32>, vector<1x16xf32>, vector<1x16xf32>, vector<1x16xf32>, vector<1x16xf32>, vector<1x16xf32>, vector<1x16xf32> -> vector<8x16xf32>
    %53 = arith.addf %42, %52 : vector<8x16xf32>
    %54 = arith.addf %53, %10 : vector<8x16xf32>
    %cst_30 = arith.constant dense<0xFF800000> : vector<8xf32>
    %55 = vector.multi_reduction <maximumf>, %54, %cst_30 [1] : vector<8x16xf32> to vector<8xf32>
    %56 = vector.shape_cast %55 : vector<8xf32> to vector<8x1xf32>
    %57 = vector.broadcast %56 : vector<8x1xf32> to vector<8x16xf32>
    %58 = arith.subf %54, %57 : vector<8x16xf32>
    %59 = math.exp %58 : vector<8x16xf32>
    %cst_31 = arith.constant dense<0.000000e+00> : vector<8xf32>
    %60 = vector.multi_reduction <add>, %59, %cst_31 [1] : vector<8x16xf32> to vector<8xf32>
    %61 = vector.shape_cast %60 : vector<8xf32> to vector<8x1xf32>
    %62 = vector.broadcast %61 : vector<8x1xf32> to vector<8x16xf32>
    %63 = arith.divf %59, %62 : vector<8x16xf32>
    %64 = arith.truncf %63 : vector<8x16xf32> to vector<8x16xbf16>
    %cst_32 = arith.constant dense<0.000000e+00> : vector<8x8xf32>
    %65 = tpu.matmul %64, %41, %cst_32 {dimension_numbers = #tpu.dot_dimension_numbers<[1], [0], [0], [1], [0, 0, 1, 1], [], []>} : vector<8x16xbf16>, vector<16x8xbf16>, vector<8x8xf32> -> vector<8x8xf32>
    %66 = arith.truncf %65 : vector<8x8xf32> to vector<8x8xbf16>
    %67 = vector.extract_strided_slice %16 {offsets = [0, 0], sizes = [8, 32], strides = [1, 1]} : vector<32x32xbf16> to vector<8x32xbf16>
    %cst_33 = arith.constant dense<0.000000e+00> : vector<8x32xf32>
    %68 = tpu.matmul %66, %67, %cst_33 {dimension_numbers = #tpu.dot_dimension_numbers<[1], [0], [0], [1], [0, 0, 1, 1], [], []>} : vector<8x8xbf16>, vector<8x32xbf16>, vector<8x32xf32> -> vector<8x32xf32>
    %69 = arith.addf %38, %68 : vector<8x32xf32>
    %70 = vector.extract_strided_slice %36 {offsets = [0, 8], sizes = [8, 8], strides = [1, 1]} : vector<16x32xbf16> to vector<8x8xbf16>
    %71 = vector.extract_strided_slice %37 {offsets = [0, 8], sizes = [16, 8], strides = [1, 1]} : vector<32x64xbf16> to vector<16x8xbf16>
    %72 = vector.extract_strided_slice %37 {offsets = [0, 40], sizes = [16, 8], strides = [1, 1]} : vector<32x64xbf16> to vector<16x8xbf16>
    %cst_34 = arith.constant dense<0.000000e+00> : vector<8x16xf32>
    %73 = tpu.matmul %70, %71, %cst_34 {dimension_numbers = #tpu.dot_dimension_numbers<[1], [1], [0], [0], [0, 0, 1, 0], [], []>} : vector<8x8xbf16>, vector<16x8xbf16>, vector<8x16xf32> -> vector<8x16xf32>
    %cst_35 = arith.constant dense<0.000000e+00> : vector<8x23xf32>
    %74 = tpu.matmul %70, %23, %cst_35 {dimension_numbers = #tpu.dot_dimension_numbers<[1], [0], [0], [1], [0, 0, 1, 1], [], []>} : vector<8x8xbf16>, vector<8x23xbf16>, vector<8x23xf32> -> vector<8x23xf32>
    %75 = vector.extract_strided_slice %74 {offsets = [0, 7], sizes = [1, 16], strides = [1, 1]} : vector<8x23xf32> to vector<1x16xf32>
    %76 = vector.extract_strided_slice %74 {offsets = [1, 6], sizes = [1, 16], strides = [1, 1]} : vector<8x23xf32> to vector<1x16xf32>
    %77 = vector.extract_strided_slice %74 {offsets = [2, 5], sizes = [1, 16], strides = [1, 1]} : vector<8x23xf32> to vector<1x16xf32>
    %78 = vector.extract_strided_slice %74 {offsets = [3, 4], sizes = [1, 16], strides = [1, 1]} : vector<8x23xf32> to vector<1x16xf32>
    %79 = vector.extract_strided_slice %74 {offsets = [4, 3], sizes = [1, 16], strides = [1, 1]} : vector<8x23xf32> to vector<1x16xf32>
    %80 = vector.extract_strided_slice %74 {offsets = [5, 2], sizes = [1, 16], strides = [1, 1]} : vector<8x23xf32> to vector<1x16xf32>
    %81 = vector.extract_strided_slice %74 {offsets = [6, 1], sizes = [1, 16], strides = [1, 1]} : vector<8x23xf32> to vector<1x16xf32>
    %82 = vector.extract_strided_slice %74 {offsets = [7, 0], sizes = [1, 16], strides = [1, 1]} : vector<8x23xf32> to vector<1x16xf32>
    %83 = tpu.concatenate %75, %76, %77, %78, %79, %80, %81, %82 in 0 : vector<1x16xf32>, vector<1x16xf32>, vector<1x16xf32>, vector<1x16xf32>, vector<1x16xf32>, vector<1x16xf32>, vector<1x16xf32>, vector<1x16xf32> -> vector<8x16xf32>
    %84 = arith.addf %73, %83 : vector<8x16xf32>
    %85 = arith.addf %84, %10 : vector<8x16xf32>
    %cst_36 = arith.constant dense<0xFF800000> : vector<8xf32>
    %86 = vector.multi_reduction <maximumf>, %85, %cst_36 [1] : vector<8x16xf32> to vector<8xf32>
    %87 = vector.shape_cast %86 : vector<8xf32> to vector<8x1xf32>
    %88 = vector.broadcast %87 : vector<8x1xf32> to vector<8x16xf32>
    %89 = arith.subf %85, %88 : vector<8x16xf32>
    %90 = math.exp %89 : vector<8x16xf32>
    %cst_37 = arith.constant dense<0.000000e+00> : vector<8xf32>
    %91 = vector.multi_reduction <add>, %90, %cst_37 [1] : vector<8x16xf32> to vector<8xf32>
    %92 = vector.shape_cast %91 : vector<8xf32> to vector<8x1xf32>
    %93 = vector.broadcast %92 : vector<8x1xf32> to vector<8x16xf32>
    %94 = arith.divf %90, %93 : vector<8x16xf32>
    %95 = arith.truncf %94 : vector<8x16xf32> to vector<8x16xbf16>
    %cst_38 = arith.constant dense<0.000000e+00> : vector<8x8xf32>
    %96 = tpu.matmul %95, %72, %cst_38 {dimension_numbers = #tpu.dot_dimension_numbers<[1], [0], [0], [1], [0, 0, 1, 1], [], []>} : vector<8x16xbf16>, vector<16x8xbf16>, vector<8x8xf32> -> vector<8x8xf32>
    %97 = arith.truncf %96 : vector<8x8xf32> to vector<8x8xbf16>
    %98 = vector.extract_strided_slice %16 {offsets = [8, 0], sizes = [8, 32], strides = [1, 1]} : vector<32x32xbf16> to vector<8x32xbf16>
    %cst_39 = arith.constant dense<0.000000e+00> : vector<8x32xf32>
    %99 = tpu.matmul %97, %98, %cst_39 {dimension_numbers = #tpu.dot_dimension_numbers<[1], [0], [0], [1], [0, 0, 1, 1], [], []>} : vector<8x8xbf16>, vector<8x32xbf16>, vector<8x32xf32> -> vector<8x32xf32>
    %100 = arith.addf %69, %99 : vector<8x32xf32>
    %101 = vector.extract_strided_slice %36 {offsets = [0, 16], sizes = [8, 8], strides = [1, 1]} : vector<16x32xbf16> to vector<8x8xbf16>
    %102 = vector.extract_strided_slice %37 {offsets = [0, 16], sizes = [16, 8], strides = [1, 1]} : vector<32x64xbf16> to vector<16x8xbf16>
    %103 = vector.extract_strided_slice %37 {offsets = [0, 48], sizes = [16, 8], strides = [1, 1]} : vector<32x64xbf16> to vector<16x8xbf16>
    %cst_40 = arith.constant dense<0.000000e+00> : vector<8x16xf32>
    %104 = tpu.matmul %101, %102, %cst_40 {dimension_numbers = #tpu.dot_dimension_numbers<[1], [1], [0], [0], [0, 0, 1, 0], [], []>} : vector<8x8xbf16>, vector<16x8xbf16>, vector<8x16xf32> -> vector<8x16xf32>
    %cst_41 = arith.constant dense<0.000000e+00> : vector<8x23xf32>
    %105 = tpu.matmul %101, %23, %cst_41 {dimension_numbers = #tpu.dot_dimension_numbers<[1], [0], [0], [1], [0, 0, 1, 1], [], []>} : vector<8x8xbf16>, vector<8x23xbf16>, vector<8x23xf32> -> vector<8x23xf32>
    %106 = vector.extract_strided_slice %105 {offsets = [0, 7], sizes = [1, 16], strides = [1, 1]} : vector<8x23xf32> to vector<1x16xf32>
    %107 = vector.extract_strided_slice %105 {offsets = [1, 6], sizes = [1, 16], strides = [1, 1]} : vector<8x23xf32> to vector<1x16xf32>
    %108 = vector.extract_strided_slice %105 {offsets = [2, 5], sizes = [1, 16], strides = [1, 1]} : vector<8x23xf32> to vector<1x16xf32>
    %109 = vector.extract_strided_slice %105 {offsets = [3, 4], sizes = [1, 16], strides = [1, 1]} : vector<8x23xf32> to vector<1x16xf32>
    %110 = vector.extract_strided_slice %105 {offsets = [4, 3], sizes = [1, 16], strides = [1, 1]} : vector<8x23xf32> to vector<1x16xf32>
    %111 = vector.extract_strided_slice %105 {offsets = [5, 2], sizes = [1, 16], strides = [1, 1]} : vector<8x23xf32> to vector<1x16xf32>
    %112 = vector.extract_strided_slice %105 {offsets = [6, 1], sizes = [1, 16], strides = [1, 1]} : vector<8x23xf32> to vector<1x16xf32>
    %113 = vector.extract_strided_slice %105 {offsets = [7, 0], sizes = [1, 16], strides = [1, 1]} : vector<8x23xf32> to vector<1x16xf32>
    %114 = tpu.concatenate %106, %107, %108, %109, %110, %111, %112, %113 in 0 : vector<1x16xf32>, vector<1x16xf32>, vector<1x16xf32>, vector<1x16xf32>, vector<1x16xf32>, vector<1x16xf32>, vector<1x16xf32>, vector<1x16xf32> -> vector<8x16xf32>
    %115 = arith.addf %104, %114 : vector<8x16xf32>
    %116 = arith.addf %115, %10 : vector<8x16xf32>
    %cst_42 = arith.constant dense<0xFF800000> : vector<8xf32>
    %117 = vector.multi_reduction <maximumf>, %116, %cst_42 [1] : vector<8x16xf32> to vector<8xf32>
    %118 = vector.shape_cast %117 : vector<8xf32> to vector<8x1xf32>
    %119 = vector.broadcast %118 : vector<8x1xf32> to vector<8x16xf32>
    %120 = arith.subf %116, %119 : vector<8x16xf32>
    %121 = math.exp %120 : vector<8x16xf32>
    %cst_43 = arith.constant dense<0.000000e+00> : vector<8xf32>
    %122 = vector.multi_reduction <add>, %121, %cst_43 [1] : vector<8x16xf32> to vector<8xf32>
    %123 = vector.shape_cast %122 : vector<8xf32> to vector<8x1xf32>
    %124 = vector.broadcast %123 : vector<8x1xf32> to vector<8x16xf32>
    %125 = arith.divf %121, %124 : vector<8x16xf32>
    %126 = arith.truncf %125 : vector<8x16xf32> to vector<8x16xbf16>
    %cst_44 = arith.constant dense<0.000000e+00> : vector<8x8xf32>
    %127 = tpu.matmul %126, %103, %cst_44 {dimension_numbers = #tpu.dot_dimension_numbers<[1], [0], [0], [1], [0, 0, 1, 1], [], []>} : vector<8x16xbf16>, vector<16x8xbf16>, vector<8x8xf32> -> vector<8x8xf32>
    %128 = arith.truncf %127 : vector<8x8xf32> to vector<8x8xbf16>
    %129 = vector.extract_strided_slice %16 {offsets = [16, 0], sizes = [8, 32], strides = [1, 1]} : vector<32x32xbf16> to vector<8x32xbf16>
    %cst_45 = arith.constant dense<0.000000e+00> : vector<8x32xf32>
    %130 = tpu.matmul %128, %129, %cst_45 {dimension_numbers = #tpu.dot_dimension_numbers<[1], [0], [0], [1], [0, 0, 1, 1], [], []>} : vector<8x8xbf16>, vector<8x32xbf16>, vector<8x32xf32> -> vector<8x32xf32>
    %131 = arith.addf %100, %130 : vector<8x32xf32>
    %132 = vector.extract_strided_slice %36 {offsets = [0, 24], sizes = [8, 8], strides = [1, 1]} : vector<16x32xbf16> to vector<8x8xbf16>
    %133 = vector.extract_strided_slice %37 {offsets = [0, 24], sizes = [16, 8], strides = [1, 1]} : vector<32x64xbf16> to vector<16x8xbf16>
    %134 = vector.extract_strided_slice %37 {offsets = [0, 56], sizes = [16, 8], strides = [1, 1]} : vector<32x64xbf16> to vector<16x8xbf16>
    %cst_46 = arith.constant dense<0.000000e+00> : vector<8x16xf32>
    %135 = tpu.matmul %132, %133, %cst_46 {dimension_numbers = #tpu.dot_dimension_numbers<[1], [1], [0], [0], [0, 0, 1, 0], [], []>} : vector<8x8xbf16>, vector<16x8xbf16>, vector<8x16xf32> -> vector<8x16xf32>
    %cst_47 = arith.constant dense<0.000000e+00> : vector<8x23xf32>
    %136 = tpu.matmul %132, %23, %cst_47 {dimension_numbers = #tpu.dot_dimension_numbers<[1], [0], [0], [1], [0, 0, 1, 1], [], []>} : vector<8x8xbf16>, vector<8x23xbf16>, vector<8x23xf32> -> vector<8x23xf32>
    %137 = vector.extract_strided_slice %136 {offsets = [0, 7], sizes = [1, 16], strides = [1, 1]} : vector<8x23xf32> to vector<1x16xf32>
    %138 = vector.extract_strided_slice %136 {offsets = [1, 6], sizes = [1, 16], strides = [1, 1]} : vector<8x23xf32> to vector<1x16xf32>
    %139 = vector.extract_strided_slice %136 {offsets = [2, 5], sizes = [1, 16], strides = [1, 1]} : vector<8x23xf32> to vector<1x16xf32>
    %140 = vector.extract_strided_slice %136 {offsets = [3, 4], sizes = [1, 16], strides = [1, 1]} : vector<8x23xf32> to vector<1x16xf32>
    %141 = vector.extract_strided_slice %136 {offsets = [4, 3], sizes = [1, 16], strides = [1, 1]} : vector<8x23xf32> to vector<1x16xf32>
    %142 = vector.extract_strided_slice %136 {offsets = [5, 2], sizes = [1, 16], strides = [1, 1]} : vector<8x23xf32> to vector<1x16xf32>
    %143 = vector.extract_strided_slice %136 {offsets = [6, 1], sizes = [1, 16], strides = [1, 1]} : vector<8x23xf32> to vector<1x16xf32>
    %144 = vector.extract_strided_slice %136 {offsets = [7, 0], sizes = [1, 16], strides = [1, 1]} : vector<8x23xf32> to vector<1x16xf32>
    %145 = tpu.concatenate %137, %138, %139, %140, %141, %142, %143, %144 in 0 : vector<1x16xf32>, vector<1x16xf32>, vector<1x16xf32>, vector<1x16xf32>, vector<1x16xf32>, vector<1x16xf32>, vector<1x16xf32>, vector<1x16xf32> -> vector<8x16xf32>
    %146 = arith.addf %135, %145 : vector<8x16xf32>
    %147 = arith.addf %146, %10 : vector<8x16xf32>
    %cst_48 = arith.constant dense<0xFF800000> : vector<8xf32>
    %148 = vector.multi_reduction <maximumf>, %147, %cst_48 [1] : vector<8x16xf32> to vector<8xf32>
    %149 = vector.shape_cast %148 : vector<8xf32> to vector<8x1xf32>
    %150 = vector.broadcast %149 : vector<8x1xf32> to vector<8x16xf32>
    %151 = arith.subf %147, %150 : vector<8x16xf32>
    %152 = math.exp %151 : vector<8x16xf32>
    %cst_49 = arith.constant dense<0.000000e+00> : vector<8xf32>
    %153 = vector.multi_reduction <add>, %152, %cst_49 [1] : vector<8x16xf32> to vector<8xf32>
    %154 = vector.shape_cast %153 : vector<8xf32> to vector<8x1xf32>
    %155 = vector.broadcast %154 : vector<8x1xf32> to vector<8x16xf32>
    %156 = arith.divf %152, %155 : vector<8x16xf32>
    %157 = arith.truncf %156 : vector<8x16xf32> to vector<8x16xbf16>
    %cst_50 = arith.constant dense<0.000000e+00> : vector<8x8xf32>
    %158 = tpu.matmul %157, %134, %cst_50 {dimension_numbers = #tpu.dot_dimension_numbers<[1], [0], [0], [1], [0, 0, 1, 1], [], []>} : vector<8x16xbf16>, vector<16x8xbf16>, vector<8x8xf32> -> vector<8x8xf32>
    %159 = arith.truncf %158 : vector<8x8xf32> to vector<8x8xbf16>
    %160 = vector.extract_strided_slice %16 {offsets = [24, 0], sizes = [8, 32], strides = [1, 1]} : vector<32x32xbf16> to vector<8x32xbf16>
    %cst_51 = arith.constant dense<0.000000e+00> : vector<8x32xf32>
    %161 = tpu.matmul %159, %160, %cst_51 {dimension_numbers = #tpu.dot_dimension_numbers<[1], [0], [0], [1], [0, 0, 1, 1], [], []>} : vector<8x8xbf16>, vector<8x32xbf16>, vector<8x32xf32> -> vector<8x32xf32>
    %162 = arith.addf %131, %161 : vector<8x32xf32>
    %cst_52 = arith.constant 0.000000e+00 : f32
    %163 = vector.broadcast %cst_52 : f32 to vector<8x32xf32>
    %164 = vector.extract_strided_slice %36 {offsets = [8, 0], sizes = [8, 8], strides = [1, 1]} : vector<16x32xbf16> to vector<8x8xbf16>
    %165 = vector.extract_strided_slice %37 {offsets = [16, 0], sizes = [16, 8], strides = [1, 1]} : vector<32x64xbf16> to vector<16x8xbf16>
    %166 = vector.extract_strided_slice %37 {offsets = [16, 32], sizes = [16, 8], strides = [1, 1]} : vector<32x64xbf16> to vector<16x8xbf16>
    %cst_53 = arith.constant dense<0.000000e+00> : vector<8x16xf32>
    %167 = tpu.matmul %164, %165, %cst_53 {dimension_numbers = #tpu.dot_dimension_numbers<[1], [1], [0], [0], [0, 0, 1, 0], [], []>} : vector<8x8xbf16>, vector<16x8xbf16>, vector<8x16xf32> -> vector<8x16xf32>
    %cst_54 = arith.constant dense<0.000000e+00> : vector<8x23xf32>
    %168 = tpu.matmul %164, %23, %cst_54 {dimension_numbers = #tpu.dot_dimension_numbers<[1], [0], [0], [1], [0, 0, 1, 1], [], []>} : vector<8x8xbf16>, vector<8x23xbf16>, vector<8x23xf32> -> vector<8x23xf32>
    %169 = vector.extract_strided_slice %168 {offsets = [0, 7], sizes = [1, 16], strides = [1, 1]} : vector<8x23xf32> to vector<1x16xf32>
    %170 = vector.extract_strided_slice %168 {offsets = [1, 6], sizes = [1, 16], strides = [1, 1]} : vector<8x23xf32> to vector<1x16xf32>
    %171 = vector.extract_strided_slice %168 {offsets = [2, 5], sizes = [1, 16], strides = [1, 1]} : vector<8x23xf32> to vector<1x16xf32>
    %172 = vector.extract_strided_slice %168 {offsets = [3, 4], sizes = [1, 16], strides = [1, 1]} : vector<8x23xf32> to vector<1x16xf32>
    %173 = vector.extract_strided_slice %168 {offsets = [4, 3], sizes = [1, 16], strides = [1, 1]} : vector<8x23xf32> to vector<1x16xf32>
    %174 = vector.extract_strided_slice %168 {offsets = [5, 2], sizes = [1, 16], strides = [1, 1]} : vector<8x23xf32> to vector<1x16xf32>
    %175 = vector.extract_strided_slice %168 {offsets = [6, 1], sizes = [1, 16], strides = [1, 1]} : vector<8x23xf32> to vector<1x16xf32>
    %176 = vector.extract_strided_slice %168 {offsets = [7, 0], sizes = [1, 16], strides = [1, 1]} : vector<8x23xf32> to vector<1x16xf32>
    %177 = tpu.concatenate %169, %170, %171, %172, %173, %174, %175, %176 in 0 : vector<1x16xf32>, vector<1x16xf32>, vector<1x16xf32>, vector<1x16xf32>, vector<1x16xf32>, vector<1x16xf32>, vector<1x16xf32>, vector<1x16xf32> -> vector<8x16xf32>
    %178 = arith.addf %167, %177 : vector<8x16xf32>
    %179 = arith.addf %178, %10 : vector<8x16xf32>
    %cst_55 = arith.constant dense<0xFF800000> : vector<8xf32>
    %180 = vector.multi_reduction <maximumf>, %179, %cst_55 [1] : vector<8x16xf32> to vector<8xf32>
    %181 = vector.shape_cast %180 : vector<8xf32> to vector<8x1xf32>
    %182 = vector.broadcast %181 : vector<8x1xf32> to vector<8x16xf32>
    %183 = arith.subf %179, %182 : vector<8x16xf32>
    %184 = math.exp %183 : vector<8x16xf32>
    %cst_56 = arith.constant dense<0.000000e+00> : vector<8xf32>
    %185 = vector.multi_reduction <add>, %184, %cst_56 [1] : vector<8x16xf32> to vector<8xf32>
    %186 = vector.shape_cast %185 : vector<8xf32> to vector<8x1xf32>
    %187 = vector.broadcast %186 : vector<8x1xf32> to vector<8x16xf32>
    %188 = arith.divf %184, %187 : vector<8x16xf32>
    %189 = arith.truncf %188 : vector<8x16xf32> to vector<8x16xbf16>
    %cst_57 = arith.constant dense<0.000000e+00> : vector<8x8xf32>
    %190 = tpu.matmul %189, %166, %cst_57 {dimension_numbers = #tpu.dot_dimension_numbers<[1], [0], [0], [1], [0, 0, 1, 1], [], []>} : vector<8x16xbf16>, vector<16x8xbf16>, vector<8x8xf32> -> vector<8x8xf32>
    %191 = arith.truncf %190 : vector<8x8xf32> to vector<8x8xbf16>
    %192 = vector.extract_strided_slice %16 {offsets = [0, 0], sizes = [8, 32], strides = [1, 1]} : vector<32x32xbf16> to vector<8x32xbf16>
    %cst_58 = arith.constant dense<0.000000e+00> : vector<8x32xf32>
    %193 = tpu.matmul %191, %192, %cst_58 {dimension_numbers = #tpu.dot_dimension_numbers<[1], [0], [0], [1], [0, 0, 1, 1], [], []>} : vector<8x8xbf16>, vector<8x32xbf16>, vector<8x32xf32> -> vector<8x32xf32>
    %194 = arith.addf %163, %193 : vector<8x32xf32>
    %195 = vector.extract_strided_slice %36 {offsets = [8, 8], sizes = [8, 8], strides = [1, 1]} : vector<16x32xbf16> to vector<8x8xbf16>
    %196 = vector.extract_strided_slice %37 {offsets = [16, 8], sizes = [16, 8], strides = [1, 1]} : vector<32x64xbf16> to vector<16x8xbf16>
    %197 = vector.extract_strided_slice %37 {offsets = [16, 40], sizes = [16, 8], strides = [1, 1]} : vector<32x64xbf16> to vector<16x8xbf16>
    %cst_59 = arith.constant dense<0.000000e+00> : vector<8x16xf32>
    %198 = tpu.matmul %195, %196, %cst_59 {dimension_numbers = #tpu.dot_dimension_numbers<[1], [1], [0], [0], [0, 0, 1, 0], [], []>} : vector<8x8xbf16>, vector<16x8xbf16>, vector<8x16xf32> -> vector<8x16xf32>
    %cst_60 = arith.constant dense<0.000000e+00> : vector<8x23xf32>
    %199 = tpu.matmul %195, %23, %cst_60 {dimension_numbers = #tpu.dot_dimension_numbers<[1], [0], [0], [1], [0, 0, 1, 1], [], []>} : vector<8x8xbf16>, vector<8x23xbf16>, vector<8x23xf32> -> vector<8x23xf32>
    %200 = vector.extract_strided_slice %199 {offsets = [0, 7], sizes = [1, 16], strides = [1, 1]} : vector<8x23xf32> to vector<1x16xf32>
    %201 = vector.extract_strided_slice %199 {offsets = [1, 6], sizes = [1, 16], strides = [1, 1]} : vector<8x23xf32> to vector<1x16xf32>
    %202 = vector.extract_strided_slice %199 {offsets = [2, 5], sizes = [1, 16], strides = [1, 1]} : vector<8x23xf32> to vector<1x16xf32>
    %203 = vector.extract_strided_slice %199 {offsets = [3, 4], sizes = [1, 16], strides = [1, 1]} : vector<8x23xf32> to vector<1x16xf32>
    %204 = vector.extract_strided_slice %199 {offsets = [4, 3], sizes = [1, 16], strides = [1, 1]} : vector<8x23xf32> to vector<1x16xf32>
    %205 = vector.extract_strided_slice %199 {offsets = [5, 2], sizes = [1, 16], strides = [1, 1]} : vector<8x23xf32> to vector<1x16xf32>
    %206 = vector.extract_strided_slice %199 {offsets = [6, 1], sizes = [1, 16], strides = [1, 1]} : vector<8x23xf32> to vector<1x16xf32>
    %207 = vector.extract_strided_slice %199 {offsets = [7, 0], sizes = [1, 16], strides = [1, 1]} : vector<8x23xf32> to vector<1x16xf32>
    %208 = tpu.concatenate %200, %201, %202, %203, %204, %205, %206, %207 in 0 : vector<1x16xf32>, vector<1x16xf32>, vector<1x16xf32>, vector<1x16xf32>, vector<1x16xf32>, vector<1x16xf32>, vector<1x16xf32>, vector<1x16xf32> -> vector<8x16xf32>
    %209 = arith.addf %198, %208 : vector<8x16xf32>
    %210 = arith.addf %209, %10 : vector<8x16xf32>
    %cst_61 = arith.constant dense<0xFF800000> : vector<8xf32>
    %211 = vector.multi_reduction <maximumf>, %210, %cst_61 [1] : vector<8x16xf32> to vector<8xf32>
    %212 = vector.shape_cast %211 : vector<8xf32> to vector<8x1xf32>
    %213 = vector.broadcast %212 : vector<8x1xf32> to vector<8x16xf32>
    %214 = arith.subf %210, %213 : vector<8x16xf32>
    %215 = math.exp %214 : vector<8x16xf32>
    %cst_62 = arith.constant dense<0.000000e+00> : vector<8xf32>
    %216 = vector.multi_reduction <add>, %215, %cst_62 [1] : vector<8x16xf32> to vector<8xf32>
    %217 = vector.shape_cast %216 : vector<8xf32> to vector<8x1xf32>
    %218 = vector.broadcast %217 : vector<8x1xf32> to vector<8x16xf32>
    %219 = arith.divf %215, %218 : vector<8x16xf32>
    %220 = arith.truncf %219 : vector<8x16xf32> to vector<8x16xbf16>
    %cst_63 = arith.constant dense<0.000000e+00> : vector<8x8xf32>
    %221 = tpu.matmul %220, %197, %cst_63 {dimension_numbers = #tpu.dot_dimension_numbers<[1], [0], [0], [1], [0, 0, 1, 1], [], []>} : vector<8x16xbf16>, vector<16x8xbf16>, vector<8x8xf32> -> vector<8x8xf32>
    %222 = arith.truncf %221 : vector<8x8xf32> to vector<8x8xbf16>
    %223 = vector.extract_strided_slice %16 {offsets = [8, 0], sizes = [8, 32], strides = [1, 1]} : vector<32x32xbf16> to vector<8x32xbf16>
    %cst_64 = arith.constant dense<0.000000e+00> : vector<8x32xf32>
    %224 = tpu.matmul %222, %223, %cst_64 {dimension_numbers = #tpu.dot_dimension_numbers<[1], [0], [0], [1], [0, 0, 1, 1], [], []>} : vector<8x8xbf16>, vector<8x32xbf16>, vector<8x32xf32> -> vector<8x32xf32>
    %225 = arith.addf %194, %224 : vector<8x32xf32>
    %226 = vector.extract_strided_slice %36 {offsets = [8, 16], sizes = [8, 8], strides = [1, 1]} : vector<16x32xbf16> to vector<8x8xbf16>
    %227 = vector.extract_strided_slice %37 {offsets = [16, 16], sizes = [16, 8], strides = [1, 1]} : vector<32x64xbf16> to vector<16x8xbf16>
    %228 = vector.extract_strided_slice %37 {offsets = [16, 48], sizes = [16, 8], strides = [1, 1]} : vector<32x64xbf16> to vector<16x8xbf16>
    %cst_65 = arith.constant dense<0.000000e+00> : vector<8x16xf32>
    %229 = tpu.matmul %226, %227, %cst_65 {dimension_numbers = #tpu.dot_dimension_numbers<[1], [1], [0], [0], [0, 0, 1, 0], [], []>} : vector<8x8xbf16>, vector<16x8xbf16>, vector<8x16xf32> -> vector<8x16xf32>
    %cst_66 = arith.constant dense<0.000000e+00> : vector<8x23xf32>
    %230 = tpu.matmul %226, %23, %cst_66 {dimension_numbers = #tpu.dot_dimension_numbers<[1], [0], [0], [1], [0, 0, 1, 1], [], []>} : vector<8x8xbf16>, vector<8x23xbf16>, vector<8x23xf32> -> vector<8x23xf32>
    %231 = vector.extract_strided_slice %230 {offsets = [0, 7], sizes = [1, 16], strides = [1, 1]} : vector<8x23xf32> to vector<1x16xf32>
    %232 = vector.extract_strided_slice %230 {offsets = [1, 6], sizes = [1, 16], strides = [1, 1]} : vector<8x23xf32> to vector<1x16xf32>
    %233 = vector.extract_strided_slice %230 {offsets = [2, 5], sizes = [1, 16], strides = [1, 1]} : vector<8x23xf32> to vector<1x16xf32>
    %234 = vector.extract_strided_slice %230 {offsets = [3, 4], sizes = [1, 16], strides = [1, 1]} : vector<8x23xf32> to vector<1x16xf32>
    %235 = vector.extract_strided_slice %230 {offsets = [4, 3], sizes = [1, 16], strides = [1, 1]} : vector<8x23xf32> to vector<1x16xf32>
    %236 = vector.extract_strided_slice %230 {offsets = [5, 2], sizes = [1, 16], strides = [1, 1]} : vector<8x23xf32> to vector<1x16xf32>
    %237 = vector.extract_strided_slice %230 {offsets = [6, 1], sizes = [1, 16], strides = [1, 1]} : vector<8x23xf32> to vector<1x16xf32>
    %238 = vector.extract_strided_slice %230 {offsets = [7, 0], sizes = [1, 16], strides = [1, 1]} : vector<8x23xf32> to vector<1x16xf32>
    %239 = tpu.concatenate %231, %232, %233, %234, %235, %236, %237, %238 in 0 : vector<1x16xf32>, vector<1x16xf32>, vector<1x16xf32>, vector<1x16xf32>, vector<1x16xf32>, vector<1x16xf32>, vector<1x16xf32>, vector<1x16xf32> -> vector<8x16xf32>
    %240 = arith.addf %229, %239 : vector<8x16xf32>
    %241 = arith.addf %240, %10 : vector<8x16xf32>
    %cst_67 = arith.constant dense<0xFF800000> : vector<8xf32>
    %242 = vector.multi_reduction <maximumf>, %241, %cst_67 [1] : vector<8x16xf32> to vector<8xf32>
    %243 = vector.shape_cast %242 : vector<8xf32> to vector<8x1xf32>
    %244 = vector.broadcast %243 : vector<8x1xf32> to vector<8x16xf32>
    %245 = arith.subf %241, %244 : vector<8x16xf32>
    %246 = math.exp %245 : vector<8x16xf32>
    %cst_68 = arith.constant dense<0.000000e+00> : vector<8xf32>
    %247 = vector.multi_reduction <add>, %246, %cst_68 [1] : vector<8x16xf32> to vector<8xf32>
    %248 = vector.shape_cast %247 : vector<8xf32> to vector<8x1xf32>
    %249 = vector.broadcast %248 : vector<8x1xf32> to vector<8x16xf32>
    %250 = arith.divf %246, %249 : vector<8x16xf32>
    %251 = arith.truncf %250 : vector<8x16xf32> to vector<8x16xbf16>
    %cst_69 = arith.constant dense<0.000000e+00> : vector<8x8xf32>
    %252 = tpu.matmul %251, %228, %cst_69 {dimension_numbers = #tpu.dot_dimension_numbers<[1], [0], [0], [1], [0, 0, 1, 1], [], []>} : vector<8x16xbf16>, vector<16x8xbf16>, vector<8x8xf32> -> vector<8x8xf32>
    %253 = arith.truncf %252 : vector<8x8xf32> to vector<8x8xbf16>
    %254 = vector.extract_strided_slice %16 {offsets = [16, 0], sizes = [8, 32], strides = [1, 1]} : vector<32x32xbf16> to vector<8x32xbf16>
    %cst_70 = arith.constant dense<0.000000e+00> : vector<8x32xf32>
    %255 = tpu.matmul %253, %254, %cst_70 {dimension_numbers = #tpu.dot_dimension_numbers<[1], [0], [0], [1], [0, 0, 1, 1], [], []>} : vector<8x8xbf16>, vector<8x32xbf16>, vector<8x32xf32> -> vector<8x32xf32>
    %256 = arith.addf %225, %255 : vector<8x32xf32>
    %257 = vector.extract_strided_slice %36 {offsets = [8, 24], sizes = [8, 8], strides = [1, 1]} : vector<16x32xbf16> to vector<8x8xbf16>
    %258 = vector.extract_strided_slice %37 {offsets = [16, 24], sizes = [16, 8], strides = [1, 1]} : vector<32x64xbf16> to vector<16x8xbf16>
    %259 = vector.extract_strided_slice %37 {offsets = [16, 56], sizes = [16, 8], strides = [1, 1]} : vector<32x64xbf16> to vector<16x8xbf16>
    %cst_71 = arith.constant dense<0.000000e+00> : vector<8x16xf32>
    %260 = tpu.matmul %257, %258, %cst_71 {dimension_numbers = #tpu.dot_dimension_numbers<[1], [1], [0], [0], [0, 0, 1, 0], [], []>} : vector<8x8xbf16>, vector<16x8xbf16>, vector<8x16xf32> -> vector<8x16xf32>
    %cst_72 = arith.constant dense<0.000000e+00> : vector<8x23xf32>
    %261 = tpu.matmul %257, %23, %cst_72 {dimension_numbers = #tpu.dot_dimension_numbers<[1], [0], [0], [1], [0, 0, 1, 1], [], []>} : vector<8x8xbf16>, vector<8x23xbf16>, vector<8x23xf32> -> vector<8x23xf32>
    %262 = vector.extract_strided_slice %261 {offsets = [0, 7], sizes = [1, 16], strides = [1, 1]} : vector<8x23xf32> to vector<1x16xf32>
    %263 = vector.extract_strided_slice %261 {offsets = [1, 6], sizes = [1, 16], strides = [1, 1]} : vector<8x23xf32> to vector<1x16xf32>
    %264 = vector.extract_strided_slice %261 {offsets = [2, 5], sizes = [1, 16], strides = [1, 1]} : vector<8x23xf32> to vector<1x16xf32>
    %265 = vector.extract_strided_slice %261 {offsets = [3, 4], sizes = [1, 16], strides = [1, 1]} : vector<8x23xf32> to vector<1x16xf32>
    %266 = vector.extract_strided_slice %261 {offsets = [4, 3], sizes = [1, 16], strides = [1, 1]} : vector<8x23xf32> to vector<1x16xf32>
    %267 = vector.extract_strided_slice %261 {offsets = [5, 2], sizes = [1, 16], strides = [1, 1]} : vector<8x23xf32> to vector<1x16xf32>
    %268 = vector.extract_strided_slice %261 {offsets = [6, 1], sizes = [1, 16], strides = [1, 1]} : vector<8x23xf32> to vector<1x16xf32>
    %269 = vector.extract_strided_slice %261 {offsets = [7, 0], sizes = [1, 16], strides = [1, 1]} : vector<8x23xf32> to vector<1x16xf32>
    %270 = tpu.concatenate %262, %263, %264, %265, %266, %267, %268, %269 in 0 : vector<1x16xf32>, vector<1x16xf32>, vector<1x16xf32>, vector<1x16xf32>, vector<1x16xf32>, vector<1x16xf32>, vector<1x16xf32>, vector<1x16xf32> -> vector<8x16xf32>
    %271 = arith.addf %260, %270 : vector<8x16xf32>
    %272 = arith.addf %271, %10 : vector<8x16xf32>
    %cst_73 = arith.constant dense<0xFF800000> : vector<8xf32>
    %273 = vector.multi_reduction <maximumf>, %272, %cst_73 [1] : vector<8x16xf32> to vector<8xf32>
    %274 = vector.shape_cast %273 : vector<8xf32> to vector<8x1xf32>
    %275 = vector.broadcast %274 : vector<8x1xf32> to vector<8x16xf32>
    %276 = arith.subf %272, %275 : vector<8x16xf32>
    %277 = math.exp %276 : vector<8x16xf32>
    %cst_74 = arith.constant dense<0.000000e+00> : vector<8xf32>
    %278 = vector.multi_reduction <add>, %277, %cst_74 [1] : vector<8x16xf32> to vector<8xf32>
    %279 = vector.shape_cast %278 : vector<8xf32> to vector<8x1xf32>
    %280 = vector.broadcast %279 : vector<8x1xf32> to vector<8x16xf32>
    %281 = arith.divf %277, %280 : vector<8x16xf32>
    %282 = arith.truncf %281 : vector<8x16xf32> to vector<8x16xbf16>
    %cst_75 = arith.constant dense<0.000000e+00> : vector<8x8xf32>
    %283 = tpu.matmul %282, %259, %cst_75 {dimension_numbers = #tpu.dot_dimension_numbers<[1], [0], [0], [1], [0, 0, 1, 1], [], []>} : vector<8x16xbf16>, vector<16x8xbf16>, vector<8x8xf32> -> vector<8x8xf32>
    %284 = arith.truncf %283 : vector<8x8xf32> to vector<8x8xbf16>
    %285 = vector.extract_strided_slice %16 {offsets = [24, 0], sizes = [8, 32], strides = [1, 1]} : vector<32x32xbf16> to vector<8x32xbf16>
    %cst_76 = arith.constant dense<0.000000e+00> : vector<8x32xf32>
    %286 = tpu.matmul %284, %285, %cst_76 {dimension_numbers = #tpu.dot_dimension_numbers<[1], [0], [0], [1], [0, 0, 1, 1], [], []>} : vector<8x8xbf16>, vector<8x32xbf16>, vector<8x32xf32> -> vector<8x32xf32>
    %287 = arith.addf %256, %286 : vector<8x32xf32>
    %288 = tpu.concatenate %162, %287 in 0 : vector<8x32xf32>, vector<8x32xf32> -> vector<16x32xf32>
    %289 = arith.addf %30, %288 : vector<16x32xf32>
    %cst_77 = arith.constant dense<0.000000e+00> : vector<16xf32>
    %290 = vector.multi_reduction <add>, %289, %cst_77 [1] : vector<16x32xf32> to vector<16xf32>
    %291 = vector.shape_cast %290 : vector<16xf32> to vector<16x1xf32>
    %cst_78 = arith.constant 3.200000e+01 : f32
    %292 = vector.broadcast %cst_78 : f32 to vector<16x1xf32>
    %293 = arith.divf %291, %292 : vector<16x1xf32>
    %294 = vector.broadcast %293 : vector<16x1xf32> to vector<16x32xf32>
    %295 = arith.subf %289, %294 : vector<16x32xf32>
    %296 = arith.mulf %295, %295 : vector<16x32xf32>
    %cst_79 = arith.constant dense<0.000000e+00> : vector<16xf32>
    %297 = vector.multi_reduction <add>, %296, %cst_79 [1] : vector<16x32xf32> to vector<16xf32>
    %298 = vector.shape_cast %297 : vector<16xf32> to vector<16x1xf32>
    %cst_80 = arith.constant 3.200000e+01 : f32
    %299 = vector.broadcast %cst_80 : f32 to vector<16x1xf32>
    %300 = arith.divf %298, %299 : vector<16x1xf32>
    %cst_81 = arith.constant 9.99999974E-6 : f32
    %301 = vector.broadcast %cst_81 : f32 to vector<16x1xf32>
    %302 = arith.addf %300, %301 : vector<16x1xf32>
    %303 = math.rsqrt %302 : vector<16x1xf32>
    %304 = vector.broadcast %303 : vector<16x1xf32> to vector<16x32xf32>
    %305 = arith.mulf %295, %304 : vector<16x32xf32>
    %306 = vector.broadcast %24 : vector<1x32xf32> to vector<16x32xf32>
    %307 = arith.mulf %305, %306 : vector<16x32xf32>
    %308 = vector.broadcast %25 : vector<1x32xf32> to vector<16x32xf32>
    %309 = arith.addf %307, %308 : vector<16x32xf32>
    %310 = arith.truncf %309 : vector<16x32xf32> to vector<16x32xbf16>
    %cst_82 = arith.constant dense<0.000000e+00> : vector<16x64xf32>
    %311 = tpu.matmul %310, %18, %cst_82 {dimension_numbers = #tpu.dot_dimension_numbers<[1], [0], [0], [1], [0, 0, 1, 1], [], []>} : vector<16x32xbf16>, vector<32x64xbf16>, vector<16x64xf32> -> vector<16x64xf32>
    %312 = vector.broadcast %29 : vector<1x64xf32> to vector<16x64xf32>
    %313 = arith.addf %311, %312 : vector<16x64xf32>
    %cst_83 = arith.constant 0.000000e+00 : f32
    %314 = vector.broadcast %cst_83 : f32 to vector<16x64xf32>
    %315 = arith.maximumf %313, %314 : vector<16x64xf32>
    %316 = arith.truncf %315 : vector<16x64xf32> to vector<16x64xbf16>
    %cst_84 = arith.constant dense<0.000000e+00> : vector<16x32xf32>
    %317 = tpu.matmul %316, %20, %cst_84 {dimension_numbers = #tpu.dot_dimension_numbers<[1], [0], [0], [1], [0, 0, 1, 1], [], []>} : vector<16x64xbf16>, vector<64x32xbf16>, vector<16x32xf32> -> vector<16x32xf32>
    %318 = vector.broadcast %28 : vector<1x32xf32> to vector<16x32xf32>
    %319 = arith.addf %317, %318 : vector<16x32xf32>
    %320 = arith.addf %309, %319 : vector<16x32xf32>
    %cst_85 = arith.constant dense<0.000000e+00> : vector<16xf32>
    %321 = vector.multi_reduction <add>, %320, %cst_85 [1] : vector<16x32xf32> to vector<16xf32>
    %322 = vector.shape_cast %321 : vector<16xf32> to vector<16x1xf32>
    %cst_86 = arith.constant 3.200000e+01 : f32
    %323 = vector.broadcast %cst_86 : f32 to vector<16x1xf32>
    %324 = arith.divf %322, %323 : vector<16x1xf32>
    %325 = vector.broadcast %324 : vector<16x1xf32> to vector<16x32xf32>
    %326 = arith.subf %320, %325 : vector<16x32xf32>
    %327 = arith.mulf %326, %326 : vector<16x32xf32>
    %cst_87 = arith.constant dense<0.000000e+00> : vector<16xf32>
    %328 = vector.multi_reduction <add>, %327, %cst_87 [1] : vector<16x32xf32> to vector<16xf32>
    %329 = vector.shape_cast %328 : vector<16xf32> to vector<16x1xf32>
    %cst_88 = arith.constant 3.200000e+01 : f32
    %330 = vector.broadcast %cst_88 : f32 to vector<16x1xf32>
    %331 = arith.divf %329, %330 : vector<16x1xf32>
    %cst_89 = arith.constant 9.99999974E-6 : f32
    %332 = vector.broadcast %cst_89 : f32 to vector<16x1xf32>
    %333 = arith.addf %331, %332 : vector<16x1xf32>
    %334 = math.rsqrt %333 : vector<16x1xf32>
    %335 = vector.broadcast %334 : vector<16x1xf32> to vector<16x32xf32>
    %336 = arith.mulf %326, %335 : vector<16x32xf32>
    %337 = vector.broadcast %26 : vector<1x32xf32> to vector<16x32xf32>
    %338 = arith.mulf %336, %337 : vector<16x32xf32>
    %339 = vector.broadcast %27 : vector<1x32xf32> to vector<16x32xf32>
    %340 = arith.addf %338, %339 : vector<16x32xf32>
    %c0_90 = arith.constant 0 : index
    %c0_91 = arith.constant 0 : index
    %341 = vector.load %arg12[%c0_90, %c0_91] : memref<16x32xf32, #tpu.memory_space<vmem>>, vector<16x32xf32>
    tpu.vector_store %arg12[%c0_90, %c0_91], %340 {strides = array<i32>} : memref<16x32xf32, #tpu.memory_space<vmem>>, vector<16x32xf32>,
    %342 = vector.extract_strided_slice %340 {offsets = [0, 0], sizes = [8, 32], strides = [1, 1]} : vector<16x32xf32> to vector<8x32xf32>
    %c8 = arith.constant 8 : index
    %c0_92 = arith.constant 0 : index
    %343 = vector.load %arg13[%c8, %c0_92] : memref<32x32xf32, #tpu.memory_space<vmem>>, vector<8x32xf32>
    tpu.vector_store %arg13[%c8, %c0_92], %342 {strides = array<i32>} : memref<32x32xf32, #tpu.memory_space<vmem>>, vector<8x32xf32>,
    %344 = vector.extract_strided_slice %340 {offsets = [8, 0], sizes = [8, 32], strides = [1, 1]} : vector<16x32xf32> to vector<8x32xf32>
    %c24 = arith.constant 24 : index
    %c0_93 = arith.constant 0 : index
    %345 = vector.load %arg13[%c24, %c0_93] : memref<32x32xf32, #tpu.memory_space<vmem>>, vector<8x32xf32>
    tpu.vector_store %arg13[%c24, %c0_93], %344 {strides = array<i32>} : memref<32x32xf32, #tpu.memory_space<vmem>>, vector<8x32xf32>,
    %c1_i32 = arith.constant 1 : i32
    %346 = arith.cmpi eq, %arg1, %c1_i32 : i32
    %347 = arith.extui %346 : i1 to i32
    %c0_i32_94 = arith.constant 0 : i32
    %348 = arith.cmpi ne, %347, %c0_i32_94 : i32
    scf.if %348 {
      %c0_95 = arith.constant 0 : index
      %c0_96 = arith.constant 0 : index
      %349 = vector.load %arg11[%c0_95, %c0_96] : memref<16x32xf32, #tpu.memory_space<vmem>>, vector<16x32xf32>
      tpu.vector_store %arg11[%c0_95, %c0_96], %340 {strides = array<i32>} : memref<16x32xf32, #tpu.memory_space<vmem>>, vector<16x32xf32>,
    } else {
    }
    return
  }
  func.func @transform_0(%arg0: i32, %arg1: i32) -> (i32, i32) {
    %c0_i32 = arith.constant 0 : i32
    %c0_i32_0 = arith.constant 0 : i32
    return %arg0, %c0_i32 : i32, i32
  }
  func.func @transform_1(%arg0: i32, %arg1: i32) -> (i32, i32) {
    %c0_i32 = arith.constant 0 : i32
    %c0_i32_0 = arith.constant 0 : i32
    return %arg0, %c0_i32 : i32, i32
  }
  func.func @transform_2(%arg0: i32, %arg1: i32) -> (i32, i32, i32) {
    %c0_i32 = arith.constant 0 : i32
    %c0_i32_0 = arith.constant 0 : i32
    %c0_i32_1 = arith.constant 0 : i32
    return %arg1, %c0_i32, %c0_i32_0 : i32, i32, i32
  }
  func.func @transform_3(%arg0: i32, %arg1: i32) -> (i32, i32, i32) {
    %c0_i32 = arith.constant 0 : i32
    %c0_i32_0 = arith.constant 0 : i32
    %c0_i32_1 = arith.constant 0 : i32
    return %arg1, %c0_i32, %c0_i32_0 : i32, i32, i32
  }
  func.func @transform_4(%arg0: i32, %arg1: i32) -> (i32, i32, i32) {
    %c0_i32 = arith.constant 0 : i32
    %c0_i32_0 = arith.constant 0 : i32
    %c0_i32_1 = arith.constant 0 : i32
    return %arg1, %c0_i32, %c0_i32_0 : i32, i32, i32
  }
  func.func @transform_5(%arg0: i32, %arg1: i32) -> (i32, i32, i32) {
    %c0_i32 = arith.constant 0 : i32
    %c0_i32_0 = arith.constant 0 : i32
    %c0_i32_1 = arith.constant 0 : i32
    return %arg1, %c0_i32, %c0_i32_0 : i32, i32, i32
  }
  func.func @transform_6(%arg0: i32, %arg1: i32) -> (i32, i32, i32) {
    %c0_i32 = arith.constant 0 : i32
    %c0_i32_0 = arith.constant 0 : i32
    %c0_i32_1 = arith.constant 0 : i32
    return %arg1, %c0_i32, %c0_i32_0 : i32, i32, i32
  }
  func.func @transform_7(%arg0: i32, %arg1: i32) -> (i32, i32, i32) {
    %c0_i32 = arith.constant 0 : i32
    %c0_i32_0 = arith.constant 0 : i32
    %c0_i32_1 = arith.constant 0 : i32
    return %arg1, %c0_i32, %c0_i32_0 : i32, i32, i32
  }
  func.func @transform_8(%arg0: i32, %arg1: i32) -> (i32, i32) {
    %c0_i32 = arith.constant 0 : i32
    %c0_i32_0 = arith.constant 0 : i32
    %c0_i32_1 = arith.constant 0 : i32
    return %c0_i32, %c0_i32_0 : i32, i32
  }
  func.func @transform_9(%arg0: i32, %arg1: i32) -> (i32, i32) {
    %c0_i32 = arith.constant 0 : i32
    %c0_i32_0 = arith.constant 0 : i32
    return %arg0, %c0_i32 : i32, i32
  }
}

</mosaic_0001>

<bundles_post_ra>
// kernel: transformer_mod_forward.1
= control target key start
LH: loop header
LB: loop body
LE: loop exit
PB: predicated region body
PF: predicated region fallthrough
CT: control target
= control target key end

     0   :  { %s4033_s0 = inlined_call_operand.vmem [shape: f32[16,32], index: 0, kind: input, shape index: {}]   ;;  %s4034_s1 = inlined_call_operand.vmem [shape: f32[32,32], index: 1, kind: input, shape index: {}]   ;;  %s4035_s2 = inlined_call_operand.vmem [shape: bf16[2,32,32], index: 2, kind: input, shape index: {}]   ;;  %s4036_s3 = inlined_call_operand.vmem [shape: bf16[2,32,64], index: 3, kind: input, shape index: {}]   ;;  %s4037_s4 = inlined_call_operand.vmem [shape: bf16[2,32,32], index: 4, kind: input, shape index: {}]   ;;  %s4038_s5 = inlined_call_operand.vmem [shape: bf16[2,32,64], index: 5, kind: input, shape index: {}]   ;;  %s4039_s6 = inlined_call_operand.vmem [shape: bf16[2,64,32], index: 6, kind: input, shape index: {}]   ;;  %s4040_s7 = inlined_call_operand.vmem [shape: f32[2,6,64], index: 7, kind: input, shape index: {}]   ;;  %s4041_s8 = inlined_call_operand.vmem [shape: bf16[8,23], index: 8, kind: input, shape index: {}]   ;;  %s4042_s9 = inlined_call_operand.hbm [shape: f32[16,32], index: 9, kind: output, shape index: {}]  }
   0x1   :  { %4045 = sst [smem:[#allocation7_spill]] %s4035_s2 }
   0x2   :  { %14 = vsyncpa [#allocation5], 0  ;;  %s3485_s30 = smov 0   ;;  %s3487_s10 = smov 0  }
   0x3   :  { %s3489_s11 = smov 0  }
   0x4 LB: > { %s29_s13 = sadd.s32 1, %s3408_s10  ;;  %p2882_p1 = scmp.ge.s32.totalorder %s3412_s11, 1  ;;  %s3412_s11 = sphi %s3489_s11, %s20_s11   ;;  %s3408_s10 = sphi %s3487_s10, %s4051_s10   ;;  %s3404_s30 = sphi %s3485_s30, %s4050_s30  }
   0x5   : > { %p30_p0 = scmp.ge.s32.totalorder %s29_s13, 2  ;;  %p371_p2 = scmp.lt.s32.totalorder %s3412_s11, 3 }
   0x7   : > { %s4053_s13 = smov (%p30_p0, %s29_s13), 0  ;;  %p372_p3 = pnand %p2882_p1, %p371_p2 }
   0x8   : > { %p448_p4 = scmp.lt.s32.totalorder (!%p372_p3), %s3404_s30, 1  ;;  %s4046_s2 = sld [smem:[#allocation7_spill]] (!%p372_p3) }
   0x9   : > { %375 = sbr.rel (%p372_p3) target bundleno = 7662 (0x1dee), region = 56  ;;  %p2894_p5 = scmp.ne.s32.totalorder (!%p372_p3), %s3404_s30, 0 }
   0xe   : > { %s449_s14 = scalar_select %p448_p4, %s3404_s30, 1 }
  0x10   : > { %s2947_s15 = sshll.u32 %s449_s14, 4  ;;  %s2951_s16 = sshll.u32 %s449_s14, 5 }
  0x11   : > { %s452_s19 = scalar_lea.vmem %s4046_s2, %s2947_s15  ;;  %s3514_s22 = scalar_lea.vmem %s4036_s3, %s2947_s15 }
  0x12   : > { %s3519_s25 = scalar_lea.vmem %s4037_s4, %s2947_s15  ;;  %s3524_s28 = scalar_lea.vmem %s4038_s5, %s2947_s15 }
  0x13   : > { %s3529_s17 = scalar_lea.vmem %s4039_s6, %s2951_s16  ;;  %s2893_s18 = sshll.u32 %s449_s14, 3 }
  0x14   : > { %s3534_s21 = scalar_lea.vmem %s4040_s7, %s2893_s18  ;;  %482 = sbr.rel (%p2894_p5) target bundleno = 29 (0x1d), region = 60 }
  0x19   : > { %v483_v0 = vld [vmem:[%s4033_s0] sm:$0xff]  ;;  %vm485_vm0 = vcmask 261120   ;;  %v484_v1 = vld [vmem:[%s4033_s0 + $0x8] sm:$0xff]  ;;  %v490_v4 = vld [vmem:[%s4034_s1 + $0x10] sm:$0xff] }
  0x1a   : > { %v488_v2 = vld [vmem:[%s4034_s1] sm:$0xff]  ;;  %486 = vst.msk [vmem:[#allocation2] sm:$0xff] %vm485_vm0, %v483_v0  ;;  %487 = vst.msk [vmem:[#allocation2 + $0x8] sm:$0xff] %vm485_vm0, %v484_v1  ;;  %v489_v3 = vld [vmem:[%s4034_s1 + $0x8] sm:$0xff] }
  0x1b   : > { %492 = vst.msk [vmem:[#allocation3] sm:$0xff] %vm485_vm0, %v488_v2  ;;  %v491_v5 = vld [vmem:[%s4034_s1 + $0x18] sm:$0xff]  ;;  %493 = vst.msk [vmem:[#allocation3 + $0x8] sm:$0xff] %vm485_vm0, %v489_v3 }
  0x1c   : > { %494 = vst.msk [vmem:[#allocation3 + $0x10] sm:$0xff] %vm485_vm0, %v490_v4  ;;  %495 = vst.msk [vmem:[#allocation3 + $0x18] sm:$0xff] %vm485_vm0, %v491_v5 }
  0x1d PF: > { %v3310_v6 = vld [vmem:[%s452_s19 + $0x8] sm:$0xff]   ;;  %v3414_v7 = vmov 0.0   ;;  %v3312_v9 = vld [vmem:[%s452_s19] sm:$0xff]   ;;  %vm3415_vm1 = vmmov 0   ;;  %vm669_vm2 = vcmask 1043456   ;;  %vm548_vm3 = vcmask 261120  }
  0x1e   : > { %3031 = vmatprep.subr.bf16.mxu0 %v3414_v7  ;;  %v3311_v8 = vld [vmem:[%s3514_s22 + $0x8] sm:$0xff]   ;;  %3035 = vmatprep.mubr.msk.bf16.mxu0 %vm3415_vm1, %v3414_v7  ;;  %v3313_v10 = vld [vmem:[%s3514_s22] sm:$0xff]   ;;  %vm665_vm4 = vcmask 64512   ;;  %s3416_s22 = smov 3   ;;  %s3417_s24 = smov 1   ;;  %vm735_vm5 = vcmask 1040384   ;;  %v496_v56 = vlaneseq }
  0x1f   : > { %3032 = vmatpush3.bf16.msra.mxu0 %v3310_v6  ;;  %3039 = vmatprep.subr.bf16.mxu1 %v3311_v8  ;;  %v528_v19 = vld [vmem:[%s4041_s8] sm:$0xf]  ;;  %s3418_s15 = smov 4   ;;  %s3419_s26 = smov 2   ;;  %vm737_vm6 = vcmask 1041408   ;;  %vm739_vm7 = vcmask 1042432  }
  0x20   : > { %3033 = vmatprep.subr.bf16.mxu0 %v3414_v7  ;;  %3040 = vmatpush3.bf16.msra.mxu1 %v3311_v8  ;;  %v3566_v21 = vsel %vm669_vm2, %v528_v19, 0  ;;  %s3420_s12 = smov 6   ;;  %s3421_s16 = smov 5   ;;  %vm742_vm8 = vcmask 1044480   ;;  %vm744_vm9 = vcmask 1045504   ;;  %vm746_vm10 = vcmask 1046528  }
  0x21   : > { %v529_v11 = vld [vmem:[#allocation2] sm:$0xff]  ;;  %v530_v12 = vld [vmem:[#allocation2 + $0x8] sm:$0xff]  ;;  %3041 = vmatprep.subr.bf16.mxu1 %v3313_v10  ;;  %s3422_s2 = smov 7   ;;  %s3423_s14 = smov 121   ;;  %v3614_v57 = vshrl.u32 %v496_v56, 7  ;;  %v499_v58 = vand.u32 127, %v496_v56 }
  0x22   : > { %v531_v13 = vld [vmem:[#allocation3] sm:$0xff]  ;;  %v535_v14 = vpack.c.bf16 %v530_v12, %v529_v11  ;;  %v532_v15 = vld [vmem:[#allocation3 + $0x8] sm:$0xff]  ;;  %s3424_s27 = smov 120   ;;  %v3425_v61 = vmov -1e+30   ;;  %vm796_vm12 = vcmask 130048  }
  0x23   : > { %v533_v16 = vld [vmem:[#allocation3 + $0x10] sm:$0xff]  ;;  %v534_v17 = vld [vmem:[#allocation3 + $0x18] sm:$0xff]  ;;  %3034 = vmatpush3.bf16.msra.mxu0 %v3312_v9  ;;  %v593_v18 = vpack.c.bf16 %v532_v15, %v531_v13  ;;  %v500_v59 = vadd.s32 8, %v3614_v57  ;;  %s3426_s29 = smov 96   ;;  %s3427_s18 = smov 112   ;;  %vm2630_vm13 = vcmask 523264  }
  0x24   : > { %v594_v20 = vpack.c.bf16 %v534_v17, %v533_v16  ;;  %3047 = vmatprep.subr.bf16.mxu0 %v3414_v7  ;;  %3042 = vmatpush3.bf16.msra.mxu1 %v3313_v10  ;;  %s3428_s20 = smov 88   ;;  %s3429_s19 = smov 80  }
  0x25   : > { %3043 = vmatprep.mubr.msk.bf16.mxu1 %vm548_vm3, %v593_v18  ;;  %3053 = vmatprep.subr.bf16.mxu1 %v3414_v7  ;;  %vm501_vm11 = vcmp.le.s32.totalorder %v499_v58, %v500_v59  ;;  %s4043_s23 = smov 104   ;;  %p2942_p6 = scmp.ne.s32.totalorder %s3404_s30, 1 }
  0x26   : > { %3036 = vmatmul.mubr.msk.bf16.vlgmr.msra.gmra.mxu0 %vm548_vm3, %v535_v14  ;;  %v3617_v62 = vsel %vm501_vm11, 0.0, %v3425_v61  ;;  %v511_v61 = vld [vmem:[%s3519_s25] sm:$0xf] }
  0x27   : > { %3048 = vmatpush3.bf16.msra.mxu0 %v3566_v21  ;;  %3049 = vmatprep.mubr.msk.bf16.mxu0 %vm3415_vm1, %v3414_v7 }
  0x28   : > { %3044 = vmatmul.mubr.msk.bf16.vlgmr.msra.gmra.mxu1 %vm548_vm3, %v594_v20  ;;  %3059 = vmatprep.subr.bf16.mxu0 %v3414_v7 }
  0x29   : > { %3055 = vmatprep.mubr.msk.bf16.mxu1 %vm3415_vm1, %v3414_v7 }
  0xe6   : > { %v586_v22 = vpop.f32.mrf.mxu0 }
  0xe8   : > { %v3045_v23 = vpop.f32.mrf.mxu1  ;;  %v3037_v24 = vpop.f32.mrf.mxu0 }
  0xea   : > { %v647_v25 = vpop.f32.mrf.mxu1  ;;  %v589_v26 = vpop.f32.mrf.mxu0 }
  0xeb   : > { %v3578_v27 = vpack.c.bf16 %v589_v26, %v586_v22 }
  0xec   : > { %v3046_v28 = vpop.f32.mrf.mxu1  ;;  %v3038_v29 = vpop.f32.mrf.mxu0 }
  0xed   : > { %v3580_v30 = vpack.c.bf16 %v3046_v28, %v3045_v23  ;;  %3050 = vmatmul.mubr.msk.bf16.vlgmr.msra.gmra.mxu0 %vm665_vm4, %v3578_v27 }
  0xee   : > { %v650_v31 = vpop.f32.mrf.mxu1  ;;  %3061 = vmatprep.mubr.msk.bf16.mxu0 %vm3415_vm1, %v3414_v7 }
  0xef   : > { %v3586_v32 = vpack.c.bf16 %v650_v31, %v647_v25 }
  0xf1   : > { %v753_v33 = vsel %vm665_vm4, %v3586_v32, 0 }
  0xf2   : > { %3054 = vmatpush3.bf16.xpose.msra.mxu1 %v753_v33 }
  0xf3   : > { %3065 = vmatprep.subr.bf16.mxu1 %v3414_v7 }
  0xf9   : > { %3056 = vmatmul.mubr.msk.bf16.vlgmr.msra.gmra.mxu1 %vm665_vm4, %v3578_v27 }
  0xfa   : > { %3066 = vmatpush3.bf16.msra.mxu1 %v3566_v21  ;;  %3067 = vmatprep.mubr.msk.bf16.mxu1 %vm3415_vm1, %v3414_v7 }
  0xfb   : > { %3077 = vmatprep.subr.bf16.mxu1 %v3414_v7 }
 0x1ad   : > { %v707_v34 = vpop.f32.mrf.mxu0 }
 0x1ae   : > { %720 = vrot.lane.b32.xlu1 %v707_v34, %s3416_s22  ;;  %714 = vrot.lane.b32.xlu0 %v707_v34, %s3417_s24 }
 0x1af   : > { %v3051_v35 = vpop.f32.mrf.mxu0 }
 0x1b1   : > { %v710_v36 = vpop.f32.mrf.mxu0 }
 0x1b2   : > { %723 = vrot.lane.b32.xlu1 %v707_v34, %s3418_s15  ;;  %717 = vrot.lane.b32.xlu0 %v707_v34, %s3419_s26 }
 0x1b3   : > { %v3052_v37 = vpop.f32.mrf.mxu0 }
 0x1b6   : > { %729 = vrot.lane.b32.xlu1 %v707_v34, %s3420_s12  ;;  %726 = vrot.lane.b32.xlu0 %v707_v34, %s3421_s16 }
 0x1b9   : > { %v789_v38 = vpop.f32.mrf.mxu1 }
 0x1ba   : > { %732 = vrot.lane.b32.xlu0 %v707_v34, %s3422_s2 }
 0x1bb   : > { %v3057_v39 = vpop.f32.mrf.mxu1 }
 0x1bd   : > { %v792_v40 = vpop.f32.mrf.mxu1 }
 0x1bf   : > { %v3058_v41 = vpop.f32.mrf.mxu1 }
 0x220   : > { %v721_v42 = vpop.permute.xlu1 %720  ;;  %v715_v43 = vpop.permute.xlu0 %714 }
 0x221   : > { %v736_v44 = vsel %vm735_vm5, %v707_v34, %v715_v43 }
 0x224   : > { %v724_v45 = vpop.permute.xlu1 %723  ;;  %v718_v46 = vpop.permute.xlu0 %717 }
 0x225   : > { %v738_v47 = vsel %vm737_vm6, %v736_v44, %v718_v46 }
 0x226   : > { %v740_v48 = vsel %vm739_vm7, %v738_v47, %v721_v42 }
 0x227   : > { %v741_v49 = vsel %vm669_vm2, %v740_v48, %v724_v45 }
 0x228   : > { %v727_v50 = vpop.permute.xlu0 %726  ;;  %v730_v51 = vpop.permute.xlu1 %729 }
 0x229   : > { %v743_v52 = vsel %vm742_vm8, %v741_v49, %v727_v50 }
 0x22a   : > { %v745_v54 = vsel %vm744_vm9, %v743_v52, %v730_v51 }
 0x22c   : > { %v733_v53 = vpop.permute.xlu0 %732 }
 0x22d   : > { %v747_v55 = vsel %vm746_vm10, %v745_v54, %v733_v53 }
 0x22e   : > { %749 = vrot.lane.b32.xlu1 %v747_v55, %s3423_s14  ;;  %v512_v55 = vld [vmem:[%s3519_s25 + $0x4] sm:$0xf] }
 0x22f   : > { %v3664_v56 = vsel %vm669_vm2, %v512_v55, 0 }
 0x232   : > { %858 = vrot.lane.b32.xlu1 %v3578_v27, %s3424_s27 }
 0x2a0   : > { %v750_v60 = vpop.permute.xlu1 %749 }
 0x2a1   : > { %v790_v63 = vadd.f32 %v789_v38, %v750_v60 }
 0x2a3   : > { %v795_v0 = vadd.f32 %v790_v63, %v3617_v62 }
 0x2a4   : > { %v859_v1 = vpop.permute.xlu1 %858 }
 0x2a5   : > { %3068 = vmatmul.mubr.msk.bf16.vlgmr.msra.gmra.mxu1 %vm665_vm4, %v859_v1  ;;  %v797_v2 = vsel %vm796_vm12, %v795_v0, -inf }
 0x2a6   : > { %798 = vmax.xlane.f32.xlu0 %v797_v2  ;;  %3079 = vmatprep.mubr.msk.bf16.mxu1 %vm3415_vm1, %v3414_v7 }
 0x2bc   : > { %810 = vrot.lane.b32.xlu0 %v3586_v32, %s3426_s29 }
 0x32f   : > { %v799_v3 = vpop.xlane.xlu0 %798 }
 0x330   : > { %v800_v4 = vsub.f32 %v795_v0, %v799_v3 }
 0x332   : > { %v801_v5 = vmul.f32 1.442695, %v800_v4 }
 0x333   : > { %v811_v6 = vpop.permute.xlu0 %810 }
 0x334   : > { %3320 = vpow2.f32 %v801_v5  ;;  %3060 = vmatpush3.bf16.msra.mxu0 %v811_v6 }
 0x335   : > { %3071 = vmatprep.subr.bf16.mxu0 %v3414_v7 }
 0x341   : > { %v3321_v8 = vpop.eup %3320 }
 0x342   : > { %v803_v9 = vsel %vm796_vm12, %v3321_v8, 0.0 }
 0x343   : > { %804 = vadd.xlane.f32.xlu1 %v803_v9 }
 0x354   : > { %932 = vrot.lane.b32.xlu1 %v3586_v32, %s3424_s27 }
 0x365   : > { %v897_v10 = vpop.f32.mrf.mxu1 }
 0x366   : > { %904 = vrot.lane.b32.xlu0 %v897_v10, %s3417_s24  ;;  %910 = vrot.lane.b32.xlu1 %v897_v10, %s3416_s22 }
 0x367   : > { %v3069_v11 = vpop.f32.mrf.mxu1 }
 0x369   : > { %v900_v12 = vpop.f32.mrf.mxu1 }
 0x36a   : > { %907 = vrot.lane.b32.xlu0 %v897_v10, %s3419_s26  ;;  %916 = vrot.lane.b32.xlu1 %v897_v10, %s3421_s16 }
 0x36b   : > { %v3070_v13 = vpop.f32.mrf.mxu1 }
 0x36e   : > { %913 = vrot.lane.b32.xlu0 %v897_v10, %s3418_s15  ;;  %922 = vrot.lane.b32.xlu1 %v897_v10, %s3422_s2 }
 0x372   : > { %919 = vrot.lane.b32.xlu0 %v897_v10, %s3420_s12 }
 0x3cc   : > { %v805_v14 = vpop.xlane.xlu1 %804 }
 0x3cd   : > { %3322 = vrcp.f32 %v805_v14 }
 0x3d0   : > { %v933_v15 = vpop.permute.xlu1 %932 }
 0x3d1   : > { %v939_v25 = vsel %vm665_vm4, %v933_v15, 0 }
 0x3d8   : > { %v905_v16 = vpop.permute.xlu0 %904  ;;  %v911_v17 = vpop.permute.xlu1 %910 }
 0x3d9   : > { %v925_v20 = vsel %vm735_vm5, %v897_v10, %v905_v16 }
 0x3da   : > { %v3323_v18 = vpop.eup %3322 }
 0x3db   : > { %v807_v19 = vmul.f32 %v3323_v18, %v3321_v8 }
 0x3dc   : > { %v908_v22 = vpop.permute.xlu0 %907  ;;  %v917_v26 = vpop.permute.xlu1 %916 }
 0x3dd   : > { %v926_v23 = vsel %vm737_vm6, %v925_v20, %v908_v22  ;;  %v808_v24 = vpack.c.bf16 %v807_v19, %v807_v19 }
 0x3de   : > { %v927_v28 = vsel %vm739_vm7, %v926_v23, %v911_v17 }
 0x3df   : > { %3062 = vmatmul.mubr.msk.bf16.vlgmr.msra.gmra.mxu0 %vm796_vm12, %v808_v24 }
 0x3e0   : > { %3072 = vmatpush3.bf16.xpose.msra.mxu0 %v939_v25  ;;  %v914_v29 = vpop.permute.xlu0 %913  ;;  %3073 = vmatprep.mubr.msk.bf16.mxu0 %vm3415_vm1, %v3414_v7  ;;  %v923_v35 = vpop.permute.xlu1 %922 }
 0x3e1   : > { %v928_v31 = vsel %vm669_vm2, %v927_v28, %v914_v29  ;;  %3083 = vmatprep.subr.bf16.mxu0 %v3414_v7 }
 0x3e2   : > { %v929_v33 = vsel %vm742_vm8, %v928_v31, %v917_v26 }
 0x3e4   : > { %v920_v34 = vpop.permute.xlu0 %919 }
 0x3e5   : > { %v930_v36 = vsel %vm744_vm9, %v929_v33, %v920_v34 }
 0x3e6   : > { %v931_v37 = vsel %vm746_vm10, %v930_v36, %v923_v35 }
 0x3e7   : > { %3074 = vmatmul.mubr.msk.bf16.vlgmr.msra.gmra.mxu0 %vm665_vm4, %v859_v1  ;;  %935 = vrot.lane.b32.xlu0 %v931_v37, %s3423_s14  ;;  %v3671_v1 = vsel %vm669_vm2, %v511_v61, 0 }
 0x3e8   : > { %3085 = vmatprep.mubr.msk.bf16.mxu0 %vm3415_vm1, %v3414_v7  ;;  %3084 = vmatpush3.bf16.msra.mxu0 %v3664_v56 }
 0x3e9   : > { %3095 = vmatprep.subr.bf16.mxu0 %v3414_v7 }
 0x459   : > { %v936_v42 = vpop.permute.xlu0 %935 }
 0x49f   : > { %v850_v38 = vpop.f32.mrf.mxu0 }
 0x4a0   : > { %v856_v4 = vpack.c.bf16 %v850_v38, %v850_v38 }
 0x4a1   : > { %v3063_v39 = vpop.f32.mrf.mxu0 }
 0x4a3   : > { %v853_v40 = vpop.f32.mrf.mxu0 }
 0x4a5   : > { %v3064_v41 = vpop.f32.mrf.mxu0 }
 0x4a7   : > { %v975_v43 = vpop.f32.mrf.mxu0 }
 0x4a8   : > { %v976_v44 = vadd.f32 %v975_v43, %v936_v42 }
 0x4a9   : > { %v3075_v45 = vpop.f32.mrf.mxu0 }
 0x4aa   : > { %v981_v46 = vadd.f32 %v976_v44, %v3617_v62 }
 0x4ab   : > { %v978_v47 = vpop.f32.mrf.mxu0 }
 0x4ac   : > { %v982_v48 = vsel %vm796_vm12, %v981_v46, -inf }
 0x4ad   : > { %v3076_v49 = vpop.f32.mrf.mxu0  ;;  %983 = vmax.xlane.f32.xlu1 %v982_v48 }
 0x4be   : > { %1133 = vrot.lane.b32.xlu1 %v3578_v27, %s3427_s18 }
 0x4c2   : > { %1207 = vrot.lane.b32.xlu1 %v3586_v32, %s3427_s18 }
 0x536   : > { %v984_v50 = vpop.xlane.xlu1 %983 }
 0x537   : > { %v985_v51 = vsub.f32 %v981_v46, %v984_v50 }
 0x539   : > { %v986_v52 = vmul.f32 1.442695, %v985_v51 }
 0x53a   : > { %v1134_v2 = vpop.permute.xlu1 %1133 }
 0x53b   : > { %3324 = vpow2.f32 %v986_v52 }
 0x53e   : > { %v1208_v3 = vpop.permute.xlu1 %1207 }
 0x53f   : > { %v1214_v5 = vsel %vm665_vm4, %v1208_v3, 0 }
 0x548   : > { %v3325_v53 = vpop.eup %3324 }
 0x549   : > { %v988_v54 = vsel %vm796_vm12, %v3325_v53, 0.0 }
 0x54a   : > { %989 = vadd.xlane.f32.xlu0 %v988_v54 }
 0x560   : > { %994 = vrot.lane.b32.xlu0 %v3586_v32, %s3428_s20 }
 0x5d3   : > { %v990_v58 = vpop.xlane.xlu0 %989 }
 0x5d4   : > { %3326 = vrcp.f32 %v990_v58  ;;  %v513_v58 = vld [vmem:[%s3519_s25 + $0x8] sm:$0xf] }
 0x5d7   : > { %v995_v59 = vpop.permute.xlu0 %994 }
 0x5d8   : > { %3078 = vmatpush3.bf16.msra.mxu1 %v995_v59  ;;  %v3725_v59 = vsel %vm669_vm2, %v513_v58, 0 }
 0x5d9   : > { %3089 = vmatprep.subr.bf16.mxu1 %v3414_v7 }
 0x5e1   : > { %v3327_v60 = vpop.eup %3326 }
 0x5e2   : > { %v992_v63 = vmul.f32 %v3327_v60, %v3325_v53 }
 0x5e4   : > { %v993_v0 = vpack.c.bf16 %v992_v63, %v992_v63 }
 0x5e6   : > { %3080 = vmatmul.mubr.msk.bf16.vlgmr.msra.gmra.mxu1 %vm796_vm12, %v993_v0 }
 0x5e7   : > { %3090 = vmatpush3.bf16.msra.mxu1 %v3671_v1  ;;  %3091 = vmatprep.mubr.msk.bf16.mxu1 %vm3415_vm1, %v3414_v7 }
 0x5e8   : > { %3101 = vmatprep.subr.bf16.mxu1 %v3414_v7 }
 0x5ee   : > { %3092 = vmatmul.mubr.msk.bf16.vlgmr.msra.gmra.mxu1 %vm665_vm4, %v856_v4 }
 0x5ef   : > { %3102 = vmatpush3.bf16.xpose.msra.mxu1 %v1214_v5  ;;  %3103 = vmatprep.mubr.msk.bf16.mxu1 %vm3415_vm1, %v3414_v7 }
 0x5f0   : > { %3113 = vmatprep.subr.bf16.mxu1 %v3414_v7 }
 0x5f6   : > { %3104 = vmatmul.mubr.msk.bf16.vlgmr.msra.gmra.mxu1 %vm665_vm4, %v1134_v2 }
 0x5f7   : > { %3115 = vmatprep.mubr.msk.bf16.mxu1 %vm3415_vm1, %v3414_v7  ;;  %3114 = vmatpush3.bf16.msra.mxu1 %v3725_v59 }
 0x5f8   : > { %3125 = vmatprep.subr.bf16.mxu1 %v3414_v7 }
 0x6a6   : > { %v1034_v6 = vpop.f32.mrf.mxu1 }
 0x6a7   : > { %v1040_v8 = vpack.c.bf16 %v1034_v6, %v1034_v6 }
 0x6a8   : > { %v3081_v9 = vpop.f32.mrf.mxu1 }
 0x6a9   : > { %3086 = vmatmul.mubr.msk.bf16.vlgmr.msra.gmra.mxu0 %vm665_vm4, %v1040_v8 }
 0x6aa   : > { %3096 = vmatpush3.bf16.msra.mxu0 %v3566_v21  ;;  %v1037_v10 = vpop.f32.mrf.mxu1  ;;  %3097 = vmatprep.mubr.msk.bf16.mxu0 %vm3415_vm1, %v3414_v7 }
 0x6ab   : > { %3107 = vmatprep.subr.bf16.mxu0 %v3414_v7 }
 0x6ac   : > { %v3082_v11 = vpop.f32.mrf.mxu1 }
 0x6ae   : > { %v3691_v12 = vpop.f32.mrf.mxu1 }
 0x6b0   : > { %v3093_v13 = vpop.f32.mrf.mxu1 }
 0x6b1   : > { %3098 = vmatmul.mubr.msk.bf16.vlgmr.msra.gmra.mxu0 %vm665_vm4, %v1134_v2 }
 0x6b2   : > { %v1130_v14 = vpop.f32.mrf.mxu1  ;;  %3109 = vmatprep.mubr.msk.bf16.mxu0 %vm3415_vm1, %v3414_v7 }
 0x6b4   : > { %v3094_v15 = vpop.f32.mrf.mxu1 }
 0x6b6   : > { %v1250_v16 = vpop.f32.mrf.mxu1 }
 0x6b8   : > { %v3105_v17 = vpop.f32.mrf.mxu1 }
 0x6ba   : > { %v1253_v18 = vpop.f32.mrf.mxu1 }
 0x6bc   : > { %v3106_v19 = vpop.f32.mrf.mxu1 }
 0x769   : > { %v3696_v20 = vpop.f32.mrf.mxu0 }
 0x76b   : > { %v3087_v22 = vpop.f32.mrf.mxu0 }
 0x76d   : > { %v1084_v23 = vpop.f32.mrf.mxu0 }
 0x76f   : > { %v3088_v24 = vpop.f32.mrf.mxu0 }
 0x771   : > { %v1172_v25 = vpop.f32.mrf.mxu0 }
 0x772   : > { %1182 = vrot.lane.b32.xlu1 %v1172_v25, %s3419_s26  ;;  %1179 = vrot.lane.b32.xlu0 %v1172_v25, %s3417_s24 }
 0x773   : > { %v3099_v26 = vpop.f32.mrf.mxu0 }
 0x775   : > { %v1175_v28 = vpop.f32.mrf.mxu0 }
 0x776   : > { %1188 = vrot.lane.b32.xlu1 %v1172_v25, %s3418_s15  ;;  %1185 = vrot.lane.b32.xlu0 %v1172_v25, %s3416_s22 }
 0x777   : > { %v3100_v29 = vpop.f32.mrf.mxu0 }
 0x77a   : > { %1194 = vrot.lane.b32.xlu1 %v1172_v25, %s3420_s12  ;;  %1191 = vrot.lane.b32.xlu0 %v1172_v25, %s3421_s16 }
 0x77e   : > { %1197 = vrot.lane.b32.xlu0 %v1172_v25, %s3422_s2 }
 0x7e4   : > { %v1180_v31 = vpop.permute.xlu0 %1179  ;;  %v1183_v33 = vpop.permute.xlu1 %1182 }
 0x7e5   : > { %v1200_v34 = vsel %vm735_vm5, %v1172_v25, %v1180_v31 }
 0x7e6   : > { %v1201_v35 = vsel %vm737_vm6, %v1200_v34, %v1183_v33 }
 0x7e8   : > { %v1186_v36 = vpop.permute.xlu0 %1185  ;;  %v1189_v37 = vpop.permute.xlu1 %1188 }
 0x7e9   : > { %v1202_v38 = vsel %vm739_vm7, %v1201_v35, %v1186_v36  ;;  %v1128_v35 = vadd.f32 %v3691_v12, %v3696_v20 }
 0x7ea   : > { %v1203_v39 = vsel %vm669_vm2, %v1202_v38, %v1189_v37 }
 0x7ec   : > { %v1192_v40 = vpop.permute.xlu0 %1191  ;;  %v1195_v42 = vpop.permute.xlu1 %1194 }
 0x7ed   : > { %v1204_v41 = vsel %vm742_vm8, %v1203_v39, %v1192_v40 }
 0x7ee   : > { %v1205_v43 = vsel %vm744_vm9, %v1204_v41, %v1195_v42 }
 0x7f0   : > { %v1198_v44 = vpop.permute.xlu0 %1197 }
 0x7f1   : > { %v1206_v45 = vsel %vm746_vm10, %v1205_v43, %v1198_v44 }
 0x7f2   : > { %1210 = vrot.lane.b32.xlu1 %v1206_v45, %s3423_s14 }
 0x864   : > { %v1211_v46 = vpop.permute.xlu1 %1210 }
 0x865   : > { %v1251_v47 = vadd.f32 %v1250_v16, %v1211_v46 }
 0x867   : > { %v1256_v48 = vadd.f32 %v1251_v47, %v3617_v62 }
 0x869   : > { %v1257_v49 = vsel %vm796_vm12, %v1256_v48, -inf }
 0x86a   : > { %1258 = vmax.xlane.f32.xlu0 %v1257_v49 }
 0x880   : > { %1269 = vrot.lane.b32.xlu0 %v3586_v32, %s3429_s19 }
 0x884   : > { %1437 = vrot.lane.b32.xlu0 %v3586_v32, %s4043_s23 }
 0x8f3   : > { %v1259_v50 = vpop.xlane.xlu0 %1258 }
 0x8f4   : > { %v1260_v51 = vsub.f32 %v1256_v48, %v1259_v50 }
 0x8f6   : > { %v1261_v52 = vmul.f32 1.442695, %v1260_v51 }
 0x8f7   : > { %v1270_v53 = vpop.permute.xlu0 %1269 }
 0x8f8   : > { %3328 = vpow2.f32 %v1261_v52  ;;  %3108 = vmatpush3.bf16.msra.mxu0 %v1270_v53  ;;  %v514_v52 = vld [vmem:[%s3519_s25 + $0xc] sm:$0xf]  ;;  %s4047_s25 = smov 104  }
 0x8f9   : > { %3119 = vmatprep.subr.bf16.mxu0 %v3414_v7  ;;  %v3771_v53 = vsel %vm669_vm2, %v514_v52, 0 }
 0x8fb   : > { %v1438_v3 = vpop.permute.xlu0 %1437 }
 0x8fc   : > { %v1444_v8 = vsel %vm665_vm4, %v1438_v3, 0  ;;  %v1671_v3 = vsel %vm665_vm4, %v3580_v30, 0 }
 0x905   : > { %v3329_v54 = vpop.eup %3328 }
 0x906   : > { %v1263_v55 = vsel %vm796_vm12, %v3329_v54, 0.0 }
 0x907   : > { %1264 = vadd.xlane.f32.xlu1 %v1263_v55 }
 0x918   : > { %1363 = vrot.lane.b32.xlu1 %v3578_v27, %s4043_s23  ;;  %s3431_s23 = smov 72  }
 0x990   : > { %v1265_v60 = vpop.xlane.xlu1 %1264 }
 0x991   : > { %3330 = vrcp.f32 %v1265_v60 }
 0x994   : > { %v1364_v2 = vpop.permute.xlu1 %1363 }
 0x99e   : > { %v3331_v61 = vpop.eup %3330 }
 0x99f   : > { %v1267_v63 = vmul.f32 %v3331_v61, %v3329_v54 }
 0x9a1   : > { %v1268_v0 = vpack.c.bf16 %v1267_v63, %v1267_v63 }
 0x9a3   : > { %3110 = vmatmul.mubr.msk.bf16.vlgmr.msra.gmra.mxu0 %vm796_vm12, %v1268_v0 }
 0x9a4   : > { %3120 = vmatpush3.bf16.msra.mxu0 %v3566_v21  ;;  %3121 = vmatprep.mubr.msk.bf16.mxu0 %vm3415_vm1, %v3414_v7 }
 0x9a5   : > { %3131 = vmatprep.subr.bf16.mxu0 %v3414_v7 }
 0x9ab   : > { %3122 = vmatmul.mubr.msk.bf16.vlgmr.msra.gmra.mxu0 %vm665_vm4, %v1364_v2 }
 0x9ac   : > { %3133 = vmatprep.mubr.msk.bf16.mxu0 %vm3415_vm1, %v3414_v7 }
 0xa63   : > { %v1309_v4 = vpop.f32.mrf.mxu0 }
 0xa64   : > { %v1315_v5 = vpack.c.bf16 %v1309_v4, %v1309_v4 }
 0xa65   : > { %v3111_v6 = vpop.f32.mrf.mxu0 }
 0xa66   : > { %3116 = vmatmul.mubr.msk.bf16.vlgmr.msra.gmra.mxu1 %vm665_vm4, %v1315_v5 }
 0xa67   : > { %3126 = vmatpush3.bf16.xpose.msra.mxu1 %v1444_v8  ;;  %v1312_v9 = vpop.f32.mrf.mxu0  ;;  %3127 = vmatprep.mubr.msk.bf16.mxu1 %vm3415_vm1, %v3414_v7 }
 0xa68   : > { %3137 = vmatprep.subr.bf16.mxu1 %v3414_v7 }
 0xa69   : > { %v3112_v10 = vpop.f32.mrf.mxu0 }
 0xa6b   : > { %v1402_v11 = vpop.f32.mrf.mxu0 }
 0xa6c   : > { %1412 = vrot.lane.b32.xlu0 %v1402_v11, %s3419_s26  ;;  %1409 = vrot.lane.b32.xlu1 %v1402_v11, %s3417_s24 }
 0xa6d   : > { %v3123_v13 = vpop.f32.mrf.mxu0 }
 0xa6e   : > { %3128 = vmatmul.mubr.msk.bf16.vlgmr.msra.gmra.mxu1 %vm665_vm4, %v1364_v2 }
 0xa6f   : > { %v1405_v14 = vpop.f32.mrf.mxu0  ;;  %3139 = vmatprep.mubr.msk.bf16.mxu1 %vm3415_vm1, %v3414_v7  ;;  %3138 = vmatpush3.bf16.msra.mxu1 %v3771_v53 }
 0xa70   : > { %1418 = vrot.lane.b32.xlu0 %v1402_v11, %s3418_s15  ;;  %1415 = vrot.lane.b32.xlu1 %v1402_v11, %s3416_s22 }
 0xa71   : > { %v3124_v15 = vpop.f32.mrf.mxu0  ;;  %3149 = vmatprep.subr.bf16.mxu1 %v3414_v7 }
 0xa74   : > { %1424 = vrot.lane.b32.xlu0 %v1402_v11, %s3420_s12  ;;  %1421 = vrot.lane.b32.xlu1 %v1402_v11, %s3421_s16 }
 0xa78   : > { %1427 = vrot.lane.b32.xlu1 %v1402_v11, %s3422_s2 }
 0xade   : > { %v1410_v16 = vpop.permute.xlu1 %1409  ;;  %v1413_v17 = vpop.permute.xlu0 %1412 }
 0xadf   : > { %v1430_v18 = vsel %vm735_vm5, %v1402_v11, %v1410_v16 }
 0xae0   : > { %v1431_v19 = vsel %vm737_vm6, %v1430_v18, %v1413_v17 }
 0xae2   : > { %v1416_v22 = vpop.permute.xlu1 %1415  ;;  %v1419_v23 = vpop.permute.xlu0 %1418 }
 0xae3   : > { %v1432_v24 = vsel %vm739_vm7, %v1431_v19, %v1416_v22 }
 0xae4   : > { %v1433_v25 = vsel %vm669_vm2, %v1432_v24, %v1419_v23 }
 0xae6   : > { %v1422_v26 = vpop.permute.xlu1 %1421  ;;  %v1425_v29 = vpop.permute.xlu0 %1424 }
 0xae7   : > { %v1434_v28 = vsel %vm742_vm8, %v1433_v25, %v1422_v26 }
 0xae8   : > { %v1435_v31 = vsel %vm744_vm9, %v1434_v28, %v1425_v29 }
 0xaea   : > { %v1428_v33 = vpop.permute.xlu1 %1427 }
 0xaeb   : > { %v1436_v34 = vsel %vm746_vm10, %v1435_v31, %v1428_v33 }
 0xaec   : > { %1440 = vrot.lane.b32.xlu0 %v1436_v34, %s3423_s14 }
 0xb26   : > { %v1356_v36 = vpop.f32.mrf.mxu1 }
 0xb27   : > { %v3762_v37 = vadd.f32 %v1356_v36, %v1128_v35 }
 0xb28   : > { %v3117_v38 = vpop.f32.mrf.mxu1 }
 0xb2a   : > { %v1359_v39 = vpop.f32.mrf.mxu1 }
 0xb2c   : > { %v3118_v40 = vpop.f32.mrf.mxu1 }
 0xb2e   : > { %v1480_v41 = vpop.f32.mrf.mxu1 }
 0xb30   : > { %v3129_v42 = vpop.f32.mrf.mxu1 }
 0xb32   : > { %v1483_v43 = vpop.f32.mrf.mxu1 }
 0xb34   : > { %v3130_v44 = vpop.f32.mrf.mxu1 }
 0xb5e   : > { %v1441_v45 = vpop.permute.xlu0 %1440 }
 0xb5f   : > { %v1481_v46 = vadd.f32 %v1480_v41, %v1441_v45 }
 0xb61   : > { %v1486_v47 = vadd.f32 %v1481_v46, %v3617_v62 }
 0xb63   : > { %v1487_v48 = vsel %vm796_vm12, %v1486_v47, -inf }
 0xb64   : > { %1488 = vmax.xlane.f32.xlu1 %v1487_v48 }
 0xbed   : > { %v1489_v49 = vpop.xlane.xlu1 %1488 }
 0xbee   : > { %v1490_v12 = vsub.f32 %v1486_v47, %v1489_v49 }
 0xbf0   : > { %v1491_v20 = vmul.f32 1.442695, %v1490_v12 }
 0xbf2   : > { %3332 = vpow2.f32 %v1491_v20 }
 0xbff   : > { %v3333_v50 = vpop.eup %3332 }
 0xc00   : > { %v1493_v51 = vsel %vm796_vm12, %v3333_v50, 0.0 }
 0xc01   : > { %1494 = vadd.xlane.f32.xlu0 %v1493_v51 }
 0xc17   : > { %1499 = vrot.lane.b32.xlu0 %v3586_v32, %s3431_s23  ;;  %v3782_v32 = vrot.slane %v3578_v27, 4 }
 0xc8a   : > { %v1495_v54 = vpop.xlane.xlu0 %1494 }
 0xc8b   : > { %3334 = vrcp.f32 %v1495_v54 }
 0xc8e   : > { %v1500_v55 = vpop.permute.xlu0 %1499 }
 0xc8f   : > { %3132 = vmatpush3.bf16.msra.mxu0 %v1500_v55 }
 0xc90   : > { %3143 = vmatprep.subr.bf16.mxu0 %v3414_v7 }
 0xc98   : > { %v3335_v58 = vpop.eup %3334 }
 0xc99   : > { %v1497_v60 = vmul.f32 %v3335_v58, %v3333_v50 }
 0xc9b   : > { %v1498_v61 = vpack.c.bf16 %v1497_v60, %v1497_v60 }
 0xc9d   : > { %3134 = vmatmul.mubr.msk.bf16.vlgmr.msra.gmra.mxu0 %vm796_vm12, %v1498_v61 }
 0xc9e   : > { %3144 = vmatpush3.bf16.msra.mxu0 %v3566_v21  ;;  %3145 = vmatprep.mubr.msk.bf16.mxu0 %vm3415_vm1, %v3414_v7 }
 0xc9f   : > { %3155 = vmatprep.subr.bf16.mxu0 %v3414_v7 }
 0xca5   : > { %3146 = vmatmul.mubr.msk.bf16.vlgmr.msra.gmra.mxu0 %vm665_vm4, %v3782_v32 }
 0xca6   : > { %3157 = vmatprep.mubr.msk.bf16.mxu0 %vm3415_vm1, %v3414_v7 }
 0xd5d   : > { %v1539_v63 = vpop.f32.mrf.mxu0 }
 0xd5e   : > { %v1545_v0 = vpack.c.bf16 %v1539_v63, %v1539_v63 }
 0xd5f   : > { %v3135_v2 = vpop.f32.mrf.mxu0 }
 0xd60   : > { %3140 = vmatmul.mubr.msk.bf16.vlgmr.msra.gmra.mxu1 %vm665_vm4, %v1545_v0 }
 0xd61   : > { %3150 = vmatpush3.bf16.xpose.msra.mxu1 %v1671_v3  ;;  %v1542_v4 = vpop.f32.mrf.mxu0  ;;  %3151 = vmatprep.mubr.msk.bf16.mxu1 %vm3415_vm1, %v3414_v7 }
 0xd62   : > { %3161 = vmatprep.subr.bf16.mxu1 %v3414_v7 }
 0xd63   : > { %v3136_v27 = vpop.f32.mrf.mxu0 }
 0xd65   : > { %v1631_v5 = vpop.f32.mrf.mxu0 }
 0xd66   : > { %1644 = vrot.lane.b32.xlu0 %v1631_v5, %s3416_s22  ;;  %1638 = vrot.lane.b32.xlu1 %v1631_v5, %s3417_s24 }
 0xd67   : > { %v3147_v6 = vpop.f32.mrf.mxu0 }
 0xd68   : > { %3152 = vmatmul.mubr.msk.bf16.vlgmr.msra.gmra.mxu1 %vm665_vm4, %v3782_v32 }
 0xd69   : > { %v1634_v8 = vpop.f32.mrf.mxu0  ;;  %3162 = vmatpush3.bf16.msra.mxu1 %v3566_v21  ;;  %3163 = vmatprep.mubr.msk.bf16.mxu1 %vm3415_vm1, %v3414_v7 }
 0xd6a   : > { %1650 = vrot.lane.b32.xlu0 %v1631_v5, %s3421_s16  ;;  %1641 = vrot.lane.b32.xlu1 %v1631_v5, %s3419_s26 }
 0xd6b   : > { %v3148_v9 = vpop.f32.mrf.mxu0  ;;  %3173 = vmatprep.subr.bf16.mxu1 %v3414_v7 }
 0xd6e   : > { %1656 = vrot.lane.b32.xlu0 %v1631_v5, %s3422_s2  ;;  %1647 = vrot.lane.b32.xlu1 %v1631_v5, %s3418_s15 }
 0xd72   : > { %1653 = vrot.lane.b32.xlu1 %v1631_v5, %s3420_s12 }
 0xdd8   : > { %v1639_v10 = vpop.permute.xlu1 %1638  ;;  %v1645_v11 = vpop.permute.xlu0 %1644 }
 0xdd9   : > { %v1659_v13 = vsel %vm735_vm5, %v1631_v5, %v1639_v10 }
 0xddc   : > { %v1642_v14 = vpop.permute.xlu1 %1641  ;;  %v1651_v16 = vpop.permute.xlu0 %1650 }
 0xddd   : > { %v1660_v15 = vsel %vm737_vm6, %v1659_v13, %v1642_v14 }
 0xdde   : > { %v1661_v17 = vsel %vm739_vm7, %v1660_v15, %v1645_v11 }
 0xde0   : > { %v1648_v18 = vpop.permute.xlu1 %1647  ;;  %v1657_v24 = vpop.permute.xlu0 %1656 }
 0xde1   : > { %v1662_v19 = vsel %vm669_vm2, %v1661_v17, %v1648_v18 }
 0xde2   : > { %v1663_v22 = vsel %vm742_vm8, %v1662_v19, %v1651_v16 }
 0xde4   : > { %v1654_v23 = vpop.permute.xlu1 %1653 }
 0xde5   : > { %v1664_v25 = vsel %vm744_vm9, %v1663_v22, %v1654_v23 }
 0xde6   : > { %v1665_v26 = vsel %vm746_vm10, %v1664_v25, %v1657_v24 }
 0xde7   : > { %1667 = vrot.lane.b32.xlu1 %v1665_v26, %s3423_s14 }
 0xdeb   : > { %1774 = vrot.lane.b32.xlu1 %v3782_v32, %s3424_s27 }
 0xe20   : > { %v1586_v28 = vpop.f32.mrf.mxu1 }
 0xe21   : > { %v3818_v29 = vadd.f32 %v1586_v28, %v3762_v37 }
 0xe22   : > { %v3141_v31 = vpop.f32.mrf.mxu1 }
 0xe24   : > { %v1589_v33 = vpop.f32.mrf.mxu1 }
 0xe26   : > { %v3142_v34 = vpop.f32.mrf.mxu1 }
 0xe28   : > { %v1707_v35 = vpop.f32.mrf.mxu1 }
 0xe2a   : > { %v3153_v36 = vpop.f32.mrf.mxu1 }
 0xe2c   : > { %v1710_v38 = vpop.f32.mrf.mxu1 }
 0xe2e   : > { %v3154_v39 = vpop.f32.mrf.mxu1 }
 0xe59   : > { %v1668_v40 = vpop.permute.xlu1 %1667 }
 0xe5a   : > { %v1708_v41 = vadd.f32 %v1707_v35, %v1668_v40 }
 0xe5c   : > { %v1713_v42 = vadd.f32 %v1708_v41, %v3617_v62 }
 0xe5d   : > { %v1775_v43 = vpop.permute.xlu1 %1774 }
 0xe5e   : > { %3164 = vmatmul.mubr.msk.bf16.vlgmr.msra.gmra.mxu1 %vm665_vm4, %v1775_v43  ;;  %v1714_v44 = vsel %vm796_vm12, %v1713_v42, -inf }
 0xe5f   : > { %1715 = vmax.xlane.f32.xlu0 %v1714_v44  ;;  %3175 = vmatprep.mubr.msk.bf16.mxu1 %vm3415_vm1, %v3414_v7 }
 0xe75   : > { %1727 = vrot.lane.b32.xlu0 %v3580_v30, %s3426_s29 }
 0xee8   : > { %v1716_v37 = vpop.xlane.xlu0 %1715 }
 0xee9   : > { %v1717_v45 = vsub.f32 %v1713_v42, %v1716_v37 }
 0xeeb   : > { %v1718_v46 = vmul.f32 1.442695, %v1717_v45 }
 0xeec   : > { %v1728_v47 = vpop.permute.xlu0 %1727 }
 0xeed   : > { %3336 = vpow2.f32 %v1718_v46  ;;  %3156 = vmatpush3.bf16.msra.mxu0 %v1728_v47 }
 0xeee   : > { %3167 = vmatprep.subr.bf16.mxu0 %v3414_v7 }
 0xefa   : > { %v3337_v48 = vpop.eup %3336 }
 0xefb   : > { %v1720_v49 = vsel %vm796_vm12, %v3337_v48, 0.0 }
 0xefc   : > { %1721 = vadd.xlane.f32.xlu1 %v1720_v49 }
 0xf0d   : > { %1848 = vrot.lane.b32.xlu1 %v3580_v30, %s3424_s27 }
 0xf1e   : > { %v1813_v12 = vpop.f32.mrf.mxu1 }
 0xf1f   : > { %1826 = vrot.lane.b32.xlu1 %v1813_v12, %s3416_s22  ;;  %1820 = vrot.lane.b32.xlu0 %v1813_v12, %s3417_s24 }
 0xf20   : > { %v3165_v20 = vpop.f32.mrf.mxu1 }
 0xf22   : > { %v1816_v50 = vpop.f32.mrf.mxu1 }
 0xf23   : > { %1832 = vrot.lane.b32.xlu1 %v1813_v12, %s3421_s16  ;;  %1823 = vrot.lane.b32.xlu0 %v1813_v12, %s3419_s26 }
 0xf24   : > { %v3166_v51 = vpop.f32.mrf.mxu1 }
 0xf27   : > { %1838 = vrot.lane.b32.xlu1 %v1813_v12, %s3422_s2  ;;  %1829 = vrot.lane.b32.xlu0 %v1813_v12, %s3418_s15 }
 0xf2b   : > { %1835 = vrot.lane.b32.xlu0 %v1813_v12, %s3420_s12 }
 0xf85   : > { %v1722_v52 = vpop.xlane.xlu1 %1721 }
 0xf86   : > { %3338 = vrcp.f32 %v1722_v52 }
 0xf89   : > { %v1849_v54 = vpop.permute.xlu1 %1848 }
 0xf8a   : > { %v1855_v4 = vsel %vm665_vm4, %v1849_v54, 0 }
 0xf91   : > { %v1821_v55 = vpop.permute.xlu0 %1820  ;;  %v1827_v58 = vpop.permute.xlu1 %1826 }
 0xf92   : > { %v1841_v63 = vsel %vm735_vm5, %v1813_v12, %v1821_v55 }
 0xf93   : > { %v3339_v60 = vpop.eup %3338 }
 0xf94   : > { %v1724_v61 = vmul.f32 %v3339_v60, %v3337_v48 }
 0xf95   : > { %v1824_v0 = vpop.permute.xlu0 %1823  ;;  %v1833_v27 = vpop.permute.xlu1 %1832 }
 0xf96   : > { %v1842_v2 = vsel %vm737_vm6, %v1841_v63, %v1824_v0  ;;  %v1725_v3 = vpack.c.bf16 %v1724_v61, %v1724_v61 }
 0xf97   : > { %v1843_v6 = vsel %vm739_vm7, %v1842_v2, %v1827_v58 }
 0xf98   : > { %3158 = vmatmul.mubr.msk.bf16.vlgmr.msra.gmra.mxu0 %vm796_vm12, %v1725_v3 }
 0xf99   : > { %3168 = vmatpush3.bf16.xpose.msra.mxu0 %v1855_v4  ;;  %v1830_v5 = vpop.permute.xlu0 %1829  ;;  %3169 = vmatprep.mubr.msk.bf16.mxu0 %vm3415_vm1, %v3414_v7  ;;  %v1839_v11 = vpop.permute.xlu1 %1838 }
 0xf9a   : > { %v1844_v8 = vsel %vm669_vm2, %v1843_v6, %v1830_v5  ;;  %3179 = vmatprep.subr.bf16.mxu0 %v3414_v7 }
 0xf9b   : > { %v1845_v10 = vsel %vm742_vm8, %v1844_v8, %v1833_v27 }
 0xf9d   : > { %v1836_v9 = vpop.permute.xlu0 %1835 }
 0xf9e   : > { %v1846_v13 = vsel %vm744_vm9, %v1845_v10, %v1836_v9 }
 0xf9f   : > { %v1847_v14 = vsel %vm746_vm10, %v1846_v13, %v1839_v11 }
 0xfa0   : > { %3170 = vmatmul.mubr.msk.bf16.vlgmr.msra.gmra.mxu0 %vm665_vm4, %v1775_v43  ;;  %1851 = vrot.lane.b32.xlu0 %v1847_v14, %s3423_s14 }
 0xfa1   : > { %3180 = vmatpush3.bf16.msra.mxu0 %v3664_v56  ;;  %3181 = vmatprep.mubr.msk.bf16.mxu0 %vm3415_vm1, %v3414_v7 }
 0xfa2   : > { %3191 = vmatprep.subr.bf16.mxu0 %v3414_v7 }
0x1012   : > { %v1852_v19 = vpop.permute.xlu0 %1851 }
0x1058   : > { %v1767_v15 = vpop.f32.mrf.mxu0 }
0x1059   : > { %v1773_v37 = vpack.c.bf16 %v1767_v15, %v1767_v15 }
0x105a   : > { %v3159_v16 = vpop.f32.mrf.mxu0 }
0x105c   : > { %v1770_v17 = vpop.f32.mrf.mxu0 }
0x105e   : > { %v3160_v18 = vpop.f32.mrf.mxu0 }
0x1060   : > { %v1891_v22 = vpop.f32.mrf.mxu0 }
0x1061   : > { %v1892_v23 = vadd.f32 %v1891_v22, %v1852_v19 }
0x1062   : > { %v3171_v24 = vpop.f32.mrf.mxu0 }
0x1063   : > { %v1897_v25 = vadd.f32 %v1892_v23, %v3617_v62 }
0x1064   : > { %v1894_v26 = vpop.f32.mrf.mxu0 }
0x1065   : > { %v1898_v28 = vsel %vm796_vm12, %v1897_v25, -inf }
0x1066   : > { %1899 = vmax.xlane.f32.xlu1 %v1898_v28  ;;  %v3172_v56 = vpop.f32.mrf.mxu0 }
0x1077   : > { %2043 = vrot.lane.b32.xlu1 %v3782_v32, %s3427_s18 }
0x107b   : > { %2117 = vrot.lane.b32.xlu1 %v3580_v30, %s3427_s18 }
0x10ef   : > { %v1900_v31 = vpop.xlane.xlu1 %1899 }
0x10f0   : > { %v1901_v33 = vsub.f32 %v1897_v25, %v1900_v31 }
0x10f2   : > { %v1902_v34 = vmul.f32 1.442695, %v1901_v33 }
0x10f3   : > { %v2044_v43 = vpop.permute.xlu1 %2043 }
0x10f4   : > { %3340 = vpow2.f32 %v1902_v34 }
0x10f7   : > { %v2118_v44 = vpop.permute.xlu1 %2117 }
0x10f8   : > { %v2124_v45 = vsel %vm665_vm4, %v2118_v44, 0 }
0x1101   : > { %v3341_v35 = vpop.eup %3340 }
0x1102   : > { %v1904_v36 = vsel %vm796_vm12, %v3341_v35, 0.0 }
0x1103   : > { %1905 = vadd.xlane.f32.xlu0 %v1904_v36 }
0x1119   : > { %1910 = vrot.lane.b32.xlu0 %v3580_v30, %s3428_s20 }
0x118c   : > { %v1906_v38 = vpop.xlane.xlu0 %1905 }
0x118d   : > { %3342 = vrcp.f32 %v1906_v38 }
0x1190   : > { %v1911_v39 = vpop.permute.xlu0 %1910 }
0x1191   : > { %3174 = vmatpush3.bf16.msra.mxu1 %v1911_v39 }
0x1192   : > { %3185 = vmatprep.subr.bf16.mxu1 %v3414_v7 }
0x119a   : > { %v3343_v40 = vpop.eup %3342 }
0x119b   : > { %v1908_v41 = vmul.f32 %v3343_v40, %v3341_v35 }
0x119d   : > { %v1909_v42 = vpack.c.bf16 %v1908_v41, %v1908_v41 }
0x119f   : > { %3176 = vmatmul.mubr.msk.bf16.vlgmr.msra.gmra.mxu1 %vm796_vm12, %v1909_v42 }
0x11a0   : > { %3186 = vmatpush3.bf16.msra.mxu1 %v3671_v1  ;;  %3187 = vmatprep.mubr.msk.bf16.mxu1 %vm3415_vm1, %v3414_v7 }
0x11a1   : > { %3197 = vmatprep.subr.bf16.mxu1 %v3414_v7 }
0x11a7   : > { %3188 = vmatmul.mubr.msk.bf16.vlgmr.msra.gmra.mxu1 %vm665_vm4, %v1773_v37 }
0x11a8   : > { %3198 = vmatpush3.bf16.xpose.msra.mxu1 %v2124_v45  ;;  %3199 = vmatprep.mubr.msk.bf16.mxu1 %vm3415_vm1, %v3414_v7 }
0x11a9   : > { %3209 = vmatprep.subr.bf16.mxu1 %v3414_v7 }
0x11af   : > { %3200 = vmatmul.mubr.msk.bf16.vlgmr.msra.gmra.mxu1 %vm665_vm4, %v2044_v43 }
0x11b0   : > { %3210 = vmatpush3.bf16.msra.mxu1 %v3725_v59  ;;  %3211 = vmatprep.mubr.msk.bf16.mxu1 %vm3415_vm1, %v3414_v7 }
0x11b1   : > { %3221 = vmatprep.subr.bf16.mxu1 %v3414_v7 }
0x125f   : > { %v1950_v1 = vpop.f32.mrf.mxu1 }
0x1260   : > { %v1956_v46 = vpack.c.bf16 %v1950_v1, %v1950_v1 }
0x1261   : > { %v3177_v47 = vpop.f32.mrf.mxu1 }
0x1262   : > { %3182 = vmatmul.mubr.msk.bf16.vlgmr.msra.gmra.mxu0 %vm665_vm4, %v1956_v46 }
0x1263   : > { %3192 = vmatpush3.bf16.msra.mxu0 %v3566_v21  ;;  %v1953_v48 = vpop.f32.mrf.mxu1  ;;  %3193 = vmatprep.mubr.msk.bf16.mxu0 %vm3415_vm1, %v3414_v7 }
0x1264   : > { %3203 = vmatprep.subr.bf16.mxu0 %v3414_v7 }
0x1265   : > { %v3178_v49 = vpop.f32.mrf.mxu1 }
0x1267   : > { %v3886_v59 = vpop.f32.mrf.mxu1 }
0x1269   : > { %v3189_v12 = vpop.f32.mrf.mxu1 }
0x126a   : > { %3194 = vmatmul.mubr.msk.bf16.vlgmr.msra.gmra.mxu0 %vm665_vm4, %v2044_v43 }
0x126b   : > { %v2040_v20 = vpop.f32.mrf.mxu1  ;;  %3205 = vmatprep.mubr.msk.bf16.mxu0 %vm3415_vm1, %v3414_v7 }
0x126d   : > { %v3190_v50 = vpop.f32.mrf.mxu1 }
0x126f   : > { %v2160_v51 = vpop.f32.mrf.mxu1 }
0x1271   : > { %v3201_v52 = vpop.f32.mrf.mxu1 }
0x1273   : > { %v2163_v54 = vpop.f32.mrf.mxu1 }
0x1275   : > { %v3202_v55 = vpop.f32.mrf.mxu1 }
0x1322   : > { %v3891_v58 = vpop.f32.mrf.mxu0 }
0x1324   : > { %v3183_v60 = vpop.f32.mrf.mxu0 }
0x1326   : > { %v1997_v61 = vpop.f32.mrf.mxu0 }
0x1328   : > { %v3184_v63 = vpop.f32.mrf.mxu0 }
0x132a   : > { %v2082_v0 = vpop.f32.mrf.mxu0 }
0x132b   : > { %2092 = vrot.lane.b32.xlu1 %v2082_v0, %s3419_s26  ;;  %2089 = vrot.lane.b32.xlu0 %v2082_v0, %s3417_s24 }
0x132c   : > { %v3195_v2 = vpop.f32.mrf.mxu0 }
0x132d   : > { %v2038_v2 = vadd.f32 %v3886_v59, %v3891_v58 }
0x132e   : > { %v2085_v3 = vpop.f32.mrf.mxu0 }
0x132f   : > { %2098 = vrot.lane.b32.xlu1 %v2082_v0, %s3418_s15  ;;  %2095 = vrot.lane.b32.xlu0 %v2082_v0, %s3416_s22 }
0x1330   : > { %v3196_v4 = vpop.f32.mrf.mxu0 }
0x1333   : > { %2104 = vrot.lane.b32.xlu1 %v2082_v0, %s3420_s12  ;;  %2101 = vrot.lane.b32.xlu0 %v2082_v0, %s3421_s16 }
0x1337   : > { %2107 = vrot.lane.b32.xlu0 %v2082_v0, %s3422_s2 }
0x139d   : > { %v2093_v27 = vpop.permute.xlu1 %2092  ;;  %v2090_v5 = vpop.permute.xlu0 %2089 }
0x139e   : > { %v2110_v6 = vsel %vm735_vm5, %v2082_v0, %v2090_v5 }
0x139f   : > { %v2111_v9 = vsel %vm737_vm6, %v2110_v6, %v2093_v27 }
0x13a1   : > { %v2099_v8 = vpop.permute.xlu1 %2098  ;;  %v2096_v10 = vpop.permute.xlu0 %2095 }
0x13a2   : > { %v2112_v11 = vsel %vm739_vm7, %v2111_v9, %v2096_v10 }
0x13a3   : > { %v2113_v13 = vsel %vm669_vm2, %v2112_v11, %v2099_v8 }
0x13a5   : > { %v2102_v14 = vpop.permute.xlu0 %2101  ;;  %v2105_v15 = vpop.permute.xlu1 %2104 }
0x13a6   : > { %v2114_v16 = vsel %vm742_vm8, %v2113_v13, %v2102_v14 }
0x13a7   : > { %v2115_v18 = vsel %vm744_vm9, %v2114_v16, %v2105_v15  ;;  %v3360_v16 = vld [vmem:[#allocation2] sm:$0xff] }
0x13a9   : > { %v2108_v17 = vpop.permute.xlu0 %2107 }
0x13aa   : > { %v2116_v19 = vsel %vm746_vm10, %v2115_v18, %v2108_v17  ;;  %v2497_v17 = vadd.f32 %v3360_v16, %v3818_v29  ;;  %v3319_v16 = vld [vmem:[%s3529_s17] sm:$0xff]  }
0x13ab   : > { %2120 = vrot.lane.b32.xlu1 %v2116_v19, %s3423_s14 }
0x13ac   : > { %v2499_v59 = vsel %vm548_vm3, %v2497_v17, 0.0 }
0x141d   : > { %v2121_v22 = vpop.permute.xlu1 %2120 }
0x141e   : > { %v2161_v23 = vadd.f32 %v2160_v51, %v2121_v22 }
0x1420   : > { %v2166_v24 = vadd.f32 %v2161_v23, %v3617_v62 }
0x1422   : > { %v2167_v25 = vsel %vm796_vm12, %v2166_v24, -inf }
0x1423   : > { %2168 = vmax.xlane.f32.xlu0 %v2167_v25 }
0x1439   : > { %2179 = vrot.lane.b32.xlu0 %v3580_v30, %s3429_s19 }
0x143d   : > { %2344 = vrot.lane.b32.xlu0 %v3580_v30, %s4047_s25 }
0x14ac   : > { %v2169_v26 = vpop.xlane.xlu0 %2168 }
0x14ad   : > { %v2170_v28 = vsub.f32 %v2166_v24, %v2169_v26 }
0x14af   : > { %v2171_v56 = vmul.f32 1.442695, %v2170_v28 }
0x14b0   : > { %v2180_v31 = vpop.permute.xlu0 %2179 }
0x14b1   : > { %3344 = vpow2.f32 %v2171_v56  ;;  %3204 = vmatpush3.bf16.msra.mxu0 %v2180_v31 }
0x14b2   : > { %3215 = vmatprep.subr.bf16.mxu0 %v3414_v7 }
0x14be   : > { %v3345_v33 = vpop.eup %3344 }
0x14bf   : > { %v2173_v34 = vsel %vm796_vm12, %v3345_v33, 0.0 }
0x14c0   : > { %2174 = vadd.xlane.f32.xlu1 %v2173_v34 }
0x14d1   : > { %2270 = vrot.lane.b32.xlu1 %v3782_v32, %s4047_s25  ;;  %v2345_v32 = vpop.permute.xlu0 %2344 }
0x14d2   : > { %v2351_v44 = vsel %vm665_vm4, %v2345_v32, 0 }
0x1549   : > { %v2175_v35 = vpop.xlane.xlu1 %2174 }
0x154a   : > { %3346 = vrcp.f32 %v2175_v35 }
0x154d   : > { %v2271_v40 = vpop.permute.xlu1 %2270 }
0x1557   : > { %v3347_v36 = vpop.eup %3346 }
0x1558   : > { %v2177_v38 = vmul.f32 %v3347_v36, %v3345_v33 }
0x155a   : > { %v2178_v39 = vpack.c.bf16 %v2177_v38, %v2177_v38 }
0x155c   : > { %3206 = vmatmul.mubr.msk.bf16.vlgmr.msra.gmra.mxu0 %vm796_vm12, %v2178_v39 }
0x155d   : > { %3216 = vmatpush3.bf16.msra.mxu0 %v3566_v21  ;;  %3217 = vmatprep.mubr.msk.bf16.mxu0 %vm3415_vm1, %v3414_v7 }
0x155e   : > { %3227 = vmatprep.subr.bf16.mxu0 %v3414_v7 }
0x1564   : > { %3218 = vmatmul.mubr.msk.bf16.vlgmr.msra.gmra.mxu0 %vm665_vm4, %v2271_v40 }
0x1565   : > { %3229 = vmatprep.mubr.msk.bf16.mxu0 %vm3415_vm1, %v3414_v7 }
0x161c   : > { %v2219_v41 = vpop.f32.mrf.mxu0 }
0x161d   : > { %v2225_v42 = vpack.c.bf16 %v2219_v41, %v2219_v41  ;;  %v3361_v41 = vld [vmem:[#allocation2 + $0x8] sm:$0xff] }
0x161e   : > { %v3207_v43 = vpop.f32.mrf.mxu0 }
0x161f   : > { %3212 = vmatmul.mubr.msk.bf16.vlgmr.msra.gmra.mxu1 %vm665_vm4, %v2225_v42 }
0x1620   : > { %3222 = vmatpush3.bf16.xpose.msra.mxu1 %v2351_v44  ;;  %v2222_v21 = vpop.f32.mrf.mxu0  ;;  %3223 = vmatprep.mubr.msk.bf16.mxu1 %vm3415_vm1, %v3414_v7 }
0x1621   : > { %3233 = vmatprep.subr.bf16.mxu1 %v3414_v7 }
0x1622   : > { %v3208_v37 = vpop.f32.mrf.mxu0 }
0x1624   : > { %v2309_v45 = vpop.f32.mrf.mxu0 }
0x1625   : > { %2319 = vrot.lane.b32.xlu0 %v2309_v45, %s3419_s26  ;;  %2316 = vrot.lane.b32.xlu1 %v2309_v45, %s3417_s24 }
0x1626   : > { %v3219_v1 = vpop.f32.mrf.mxu0 }
0x1627   : > { %3224 = vmatmul.mubr.msk.bf16.vlgmr.msra.gmra.mxu1 %vm665_vm4, %v2271_v40 }
0x1628   : > { %v2312_v46 = vpop.f32.mrf.mxu0  ;;  %3234 = vmatpush3.bf16.msra.mxu1 %v3771_v53  ;;  %3235 = vmatprep.mubr.msk.bf16.mxu1 %vm3415_vm1, %v3414_v7 }
0x1629   : > { %2325 = vrot.lane.b32.xlu0 %v2309_v45, %s3418_s15  ;;  %2322 = vrot.lane.b32.xlu1 %v2309_v45, %s3416_s22 }
0x162a   : > { %v3220_v47 = vpop.f32.mrf.mxu0  ;;  %3247 = vmatprep.subr.bf16.mxu1 %v3414_v7 }
0x162d   : > { %2331 = vrot.lane.b32.xlu0 %v2309_v45, %s3420_s12  ;;  %2328 = vrot.lane.b32.xlu1 %v2309_v45, %s3421_s16 }
0x1631   : > { %2334 = vrot.lane.b32.xlu1 %v2309_v45, %s3422_s2 }
0x1697   : > { %v2320_v48 = vpop.permute.xlu0 %2319  ;;  %v2317_v49 = vpop.permute.xlu1 %2316 }
0x1698   : > { %v2337_v53 = vsel %vm735_vm5, %v2309_v45, %v2317_v49 }
0x1699   : > { %v2338_v20 = vsel %vm737_vm6, %v2337_v53, %v2320_v48  ;;  %v3314_v53 = vld [vmem:[%s3524_s28 + $0x8] sm:$0xff]  }
0x169b   : > { %v2326_v12 = vpop.permute.xlu0 %2325  ;;  %v2323_v50 = vpop.permute.xlu1 %2322 }
0x169c   : > { %v2339_v51 = vsel %vm739_vm7, %v2338_v20, %v2323_v50  ;;  %v3316_v20 = vld [vmem:[%s3529_s17 + $0x18] sm:$0xff]  }
0x169d   : > { %v2340_v52 = vsel %vm669_vm2, %v2339_v51, %v2326_v12  ;;  %v3315_v12 = vld [vmem:[%s3524_s28] sm:$0xff]  }
0x169f   : > { %v2329_v54 = vpop.permute.xlu1 %2328  ;;  %v2332_v55 = vpop.permute.xlu0 %2331 }
0x16a0   : > { %v2341_v60 = vsel %vm742_vm8, %v2340_v52, %v2329_v54 }
0x16a1   : > { %v2342_v63 = vsel %vm744_vm9, %v2341_v60, %v2332_v55 }
0x16a3   : > { %v2335_v61 = vpop.permute.xlu1 %2334 }
0x16a4   : > { %v2343_v0 = vsel %vm746_vm10, %v2342_v63, %v2335_v61  ;;  %v2528_v61 = vsub.s32 0, %v3614_v57 }
0x16a5   : > { %2347 = vrot.lane.b32.xlu0 %v2343_v0, %s3423_s14  ;;  %v3977_v0 = vld [vmem:[%s3534_s21] sm:$0x3f] }
0x16df   : > { %v2263_v3 = vpop.f32.mrf.mxu1 }
0x16e0   : > { %v2269_v4 = vadd.f32 %v2263_v3, %v2038_v2  ;;  %v2529_v3 = vrot.slane %v3977_v0, %v2528_v61 }
0x16e1   : > { %v3213_v27 = vpop.f32.mrf.mxu1 }
0x16e3   : > { %v2266_v5 = vpop.f32.mrf.mxu1 }
0x16e5   : > { %v3214_v6 = vpop.f32.mrf.mxu1 }
0x16e7   : > { %v2387_v8 = vpop.f32.mrf.mxu1 }
0x16e9   : > { %v3225_v9 = vpop.f32.mrf.mxu1 }
0x16eb   : > { %v2390_v10 = vpop.f32.mrf.mxu1 }
0x16ed   : > { %v3226_v11 = vpop.f32.mrf.mxu1 }
0x1717   : > { %v2348_v13 = vpop.permute.xlu0 %2347 }
0x1718   : > { %v2388_v14 = vadd.f32 %v2387_v8, %v2348_v13 }
0x171a   : > { %v2393_v15 = vadd.f32 %v2388_v14, %v3617_v62  ;;  %v3317_v14 = vld [vmem:[%s3529_s17 + $0x10] sm:$0xff]  }
0x171c   : > { %v2394_v18 = vsel %vm796_vm12, %v2393_v15, -inf }
0x171d   : > { %2395 = vmax.xlane.f32.xlu1 %v2394_v18 }
0x1721   : > { %2500 = vadd.xlane.f32.xlu1 %v2499_v59 }
0x17a6   : > { %v2396_v58 = vpop.xlane.xlu1 %2395 }
0x17a7   : > { %v2397_v19 = vsub.f32 %v2393_v15, %v2396_v58  ;;  %v3318_v15 = vld [vmem:[%s3529_s17 + $0x8] sm:$0xff]  }
0x17a9   : > { %v2398_v22 = vmul.f32 1.442695, %v2397_v19 }
0x17aa   : > { %v2501_v35 = vpop.xlane.xlu1 %2500 }
0x17ab   : > { %3348 = vpow2.f32 %v2398_v22  ;;  %v2506_v36 = vmul.f32 0.03125, %v2501_v35 }
0x17ad   : > { %v2508_v39 = vsub.f32 %v2497_v17, %v2506_v36  ;;  %v2541_v17 = vsub.s32 5, %v3614_v57 }
0x17af   : > { %v2510_v21 = vmul.f32 %v2508_v39, %v2508_v39  ;;  %v2542_v18 = vrot.slane %v3977_v0, %v2541_v17 }
0x17b1   : > { %v2512_v45 = vsel %vm548_vm3, %v2510_v21, 0.0 }
0x17b8   : > { %v3349_v23 = vpop.eup %3348 }
0x17b9   : > { %v2400_v24 = vsel %vm796_vm12, %v3349_v23, 0.0 }
0x17ba   : > { %2401 = vadd.xlane.f32.xlu0 %v2400_v24 }
0x17d0   : > { %2406 = vrot.lane.b32.xlu0 %v3580_v30, %s3431_s23 }
0x1843   : > { %v2402_v62 = vpop.xlane.xlu0 %2401 }
0x1844   : > { %3350 = vrcp.f32 %v2402_v62 }
0x1847   : > { %v2407_v29 = vpop.permute.xlu0 %2406 }
0x1848   : > { %3228 = vmatpush3.bf16.msra.mxu0 %v2407_v29 }
0x1849   : > { %3239 = vmatprep.subr.bf16.mxu0 %v3414_v7 }
0x1851   : > { %v3351_v25 = vpop.eup %3350 }
0x1852   : > { %v2404_v26 = vmul.f32 %v3351_v25, %v3349_v23 }
0x1854   : > { %v2405_v28 = vpack.c.bf16 %v2404_v26, %v2404_v26  ;;  %v2604_v26 = vsub.s32 4, %v3614_v57 }
0x1856   : > { %3230 = vmatmul.mubr.msk.bf16.vlgmr.msra.gmra.mxu0 %vm796_vm12, %v2405_v28 }
0x1857   : > { %3243 = vmatprep.mubr.msk.bf16.mxu0 %vm3415_vm1, %v3414_v7  ;;  %3240 = vmatpush3.bf16.msra.mxu0 %v3314_v53 }
0x1858   : > { %3241 = vmatprep.subr.bf16.mxu0 %v3414_v7 }
0x185b   : > { %3242 = vmatpush3.bf16.msra.mxu0 %v3315_v12 }
0x1916   : > { %v2446_v56 = vpop.f32.mrf.mxu0 }
0x1917   : > { %v2452_v31 = vpack.c.bf16 %v2446_v56, %v2446_v56 }
0x1918   : > { %v3231_v33 = vpop.f32.mrf.mxu0 }
0x1919   : > { %3236 = vmatmul.mubr.msk.bf16.vlgmr.msra.gmra.mxu1 %vm665_vm4, %v2452_v31 }
0x191a   : > { %v2449_v30 = vpop.f32.mrf.mxu0  ;;  %3255 = vmatprep.mubr.msk.bf16.mxu1 %vm3415_vm1, %v3414_v7  ;;  %3248 = vmatpush3.bf16.msra.mxu1 %v3316_v20  ;;  %v2705_v20 = vsub.s32 2, %v3614_v57 }
0x191b   : > { %3249 = vmatprep.subr.bf16.mxu1 %v3414_v7 }
0x191c   : > { %v3232_v34 = vpop.f32.mrf.mxu0 }
0x191e   : > { %3250 = vmatpush3.bf16.msra.mxu1 %v3317_v14 }
0x191f   : > { %3251 = vmatprep.subr.bf16.mxu1 %v3414_v7 }
0x1922   : > { %3252 = vmatpush3.bf16.msra.mxu1 %v3318_v15 }
0x1923   : > { %3253 = vmatprep.subr.bf16.mxu1 %v3414_v7  ;;  %v2605_v7 = vrot.slane %v3977_v0, %v2604_v26 }
0x1926   : > { %3254 = vmatpush3.bf16.msra.mxu1 %v3319_v16 }
0x19d9   : > { %v2490_v38 = vpop.f32.mrf.mxu1 }
0x19da   : > { %v2496_v40 = vadd.f32 %v2490_v38, %v2269_v4  ;;  %v2534_v4 = vsub.s32 1, %v3614_v57 }
0x19db   : > { %v3237_v32 = vpop.f32.mrf.mxu1 }
0x19dc   : > { %v2498_v42 = vadd.f32 %v3361_v41, %v2496_v40  ;;  %v2535_v8 = vrot.slane %v3977_v0, %v2534_v4 }
0x19dd   : > { %v2493_v43 = vpop.f32.mrf.mxu1 }
0x19de   : > { %v2502_v44 = vsel %vm548_vm3, %v2498_v42, 0.0 }
0x19df   : > { %2503 = vadd.xlane.f32.xlu1 %v2502_v44  ;;  %v3238_v37 = vpop.f32.mrf.mxu1 }
0x19e3   : > { %2513 = vadd.xlane.f32.xlu1 %v2512_v45 }
0x1a68   : > { %v2504_v1 = vpop.xlane.xlu1 %2503 }
0x1a69   : > { %v2507_v46 = vmul.f32 0.03125, %v2504_v1 }
0x1a6b   : > { %v2509_v47 = vsub.f32 %v2498_v42, %v2507_v46 }
0x1a6c   : > { %v2514_v50 = vpop.xlane.xlu1 %2513 }
0x1a6d   : > { %v2511_v48 = vmul.f32 %v2509_v47, %v2509_v47  ;;  %v2518_v51 = vmul.f32 0.03125, %v2514_v50  ;;  %v2711_v50 = vsub.s32 3, %v3614_v57 }
0x1a6f   : > { %v2515_v49 = vsel %vm548_vm3, %v2511_v48, 0.0  ;;  %v2520_v52 = vadd.f32 1e-05, %v2518_v51  ;;  %v2706_v51 = vrot.slane %v3977_v0, %v2705_v20 }
0x1a70   : > { %2516 = vadd.xlane.f32.xlu1 %v2515_v49 }
0x1a71   : > { %3352 = vrsqrt.f32 %v2520_v52 }
0x1a7e   : > { %v3353_v63 = vpop.eup %3352 }
0x1a7f   : > { %v2524_v2 = vmul.f32 %v3353_v63, %v2508_v39 }
0x1a81   : > { %v2530_v6 = vmul.f32 %v2529_v3, %v2524_v2 }
0x1a83   : > { %v2536_v10 = vadd.f32 %v2535_v8, %v2530_v6 }
0x1af9   : > { %v2517_v54 = vpop.xlane.xlu1 %2516 }
0x1afa   : > { %v2519_v55 = vmul.f32 0.03125, %v2517_v54  ;;  %v2712_v54 = vrot.slane %v3977_v0, %v2711_v50 }
0x1afc   : > { %v2521_v60 = vadd.f32 1e-05, %v2519_v55 }
0x1afe   : > { %3354 = vrsqrt.f32 %v2521_v60 }
0x1b0b   : > { %v3355_v27 = vpop.eup %3354 }
0x1b0c   : > { %v2525_v5 = vmul.f32 %v3355_v27, %v2509_v47 }
0x1b0e   : > { %v2531_v9 = vmul.f32 %v2529_v3, %v2525_v5 }
0x1b10   : > { %v2537_v11 = vadd.f32 %v2535_v8, %v2531_v9 }
0x1b12   : > { %v2538_v13 = vpack.c.bf16 %v2537_v11, %v2536_v10 }
0x1b14   : > { %3244 = vmatmul.mubr.msk.bf16.vlgmr.msra.gmra.mxu0 %vm548_vm3, %v2538_v13 }
0x1bd4   : > { %v2592_v59 = vpop.f32.mrf.mxu0 }
0x1bd5   : > { %v2593_v19 = vadd.f32 %v2592_v59, %v2542_v18 }
0x1bd6   : > { %v3245_v58 = vpop.f32.mrf.mxu0 }
0x1bd7   : > { %v2599_v62 = vmax.f32 %v2593_v19, 0.0 }
0x1bd8   : > { %v2595_v22 = vpop.f32.mrf.mxu0 }
0x1bd9   : > { %v2596_v23 = vadd.f32 %v2595_v22, %v2542_v18 }
0x1bda   : > { %v3246_v24 = vpop.f32.mrf.mxu0 }
0x1bdb   : > { %v2600_v29 = vmax.f32 %v2596_v23, 0.0 }
0x1bdd   : > { %v2601_v25 = vpack.c.bf16 %v2600_v29, %v2599_v62 }
0x1bdf   : > { %3256 = vmatmul.mubr.msk.bf16.vlgmr.msra.gmra.mxu1 %vm2630_vm13, %v2601_v25 }
0x1c9f   : > { %v2668_v28 = vpop.f32.mrf.mxu1 }
0x1ca0   : > { %v2669_v56 = vadd.f32 %v2668_v28, %v2605_v7 }
0x1ca1   : > { %v3257_v31 = vpop.f32.mrf.mxu1 }
0x1ca2   : > { %v2675_v33 = vadd.f32 %v2669_v56, %v2536_v10 }
0x1ca3   : > { %v2671_v30 = vpop.f32.mrf.mxu1 }
0x1ca4   : > { %v2672_v34 = vadd.f32 %v2671_v30, %v2605_v7  ;;  %v2677_v35 = vsel %vm548_vm3, %v2675_v33, 0.0 }
0x1ca5   : > { %2678 = vadd.xlane.f32.xlu1 %v2677_v35  ;;  %v3258_v36 = vpop.f32.mrf.mxu1 }
0x1ca6   : > { %v2676_v38 = vadd.f32 %v2672_v34, %v2537_v11 }
0x1ca8   : > { %v2680_v39 = vsel %vm548_vm3, %v2676_v38, 0.0 }
0x1ca9   : > { %2681 = vadd.xlane.f32.xlu1 %v2680_v39 }
0x1d2e   : > { %v2679_v40 = vpop.xlane.xlu1 %2678 }
0x1d2f   : > { %v2683_v32 = vmul.f32 0.03125, %v2679_v40 }
0x1d31   : > { %v2685_v41 = vsub.f32 %v2675_v33, %v2683_v32 }
0x1d32   : > { %v2682_v42 = vpop.xlane.xlu1 %2681 }
0x1d33   : > { %v2684_v43 = vmul.f32 0.03125, %v2682_v42  ;;  %v2687_v44 = vmul.f32 %v2685_v41, %v2685_v41 }
0x1d35   : > { %v2686_v21 = vsub.f32 %v2676_v38, %v2684_v43  ;;  %v2689_v37 = vsel %vm548_vm3, %v2687_v44, 0.0 }
0x1d36   : > { %2690 = vadd.xlane.f32.xlu0 %v2689_v37 }
0x1d37   : > { %v2688_v45 = vmul.f32 %v2686_v21, %v2686_v21 }
0x1d39   : > { %v2692_v1 = vsel %vm548_vm3, %v2688_v45, 0.0 }
0x1d3a   : > { %2693 = vadd.xlane.f32.xlu1 %v2692_v1 }
0x1dbf   : > { %v2691_v46 = vpop.xlane.xlu0 %2690 }
0x1dc0   : > { %v2695_v47 = vmul.f32 0.03125, %v2691_v46 }
0x1dc2   : > { %v2697_v48 = vadd.f32 1e-05, %v2695_v47 }
0x1dc3   : > { %v2694_v49 = vpop.xlane.xlu1 %2693 }
0x1dc4   : > { %3356 = vrsqrt.f32 %v2697_v48  ;;  %v2696_v53 = vmul.f32 0.03125, %v2694_v49 }
0x1dc6   : > { %v2698_v12 = vadd.f32 1e-05, %v2696_v53 }
0x1dc8   : > { %3358 = vrsqrt.f32 %v2698_v12 }
0x1dd1   : > { %v3357_v52 = vpop.eup %3356 }
0x1dd2   : > { %v2701_v55 = vmul.f32 %v3357_v52, %v2685_v41 }
0x1dd4   : > { %v2707_v60 = vmul.f32 %v2706_v51, %v2701_v55 }
0x1dd5   : > { %v3359_v61 = vpop.eup %3358 }
0x1dd6   : > { %v2713_v63 = vadd.f32 %v2712_v54, %v2707_v60  ;;  %v2702_v2 = vmul.f32 %v3359_v61, %v2686_v21 }
0x1dd8   : > { %2715 = vst.msk [vmem:[#allocation2] sm:$0xff] %vm548_vm3, %v2713_v63  ;;  %2717 = vst.msk [vmem:[#allocation3 + $0x8] sm:$0xff] %vm548_vm3, %v2713_v63  ;;  %v2708_v3 = vmul.f32 %v2706_v51, %v2702_v2  ;;  %2722 = sbr.rel (%p2942_p6) target bundleno = 7646 (0x1dde), region = 64 }
0x1dda   : > { %v2714_v4 = vadd.f32 %v2712_v54, %v2708_v3 }
0x1ddc   : > { %2716 = vst.msk [vmem:[#allocation2 + $0x8] sm:$0xff] %vm548_vm3, %v2714_v4  ;;  %2718 = vst.msk [vmem:[#allocation3 + $0x18] sm:$0xff] %vm548_vm3, %v2714_v4 }
0x1ddd   : > { %2723 = vst.msk [vmem:[#allocation4] sm:$0xff] %vm548_vm3, %v2713_v63  ;;  %2724 = vst.msk [vmem:[#allocation4 + $0x8] sm:$0xff] %vm548_vm3, %v2714_v4 }
0x1dde PF: > { %s4048_s28 = sadd.s32 4294967295, %s3412_s11   ;;  %s3432_s21 = smov [#allocation4]  }
0x1ddf   : > { %p4009_p7 = scmp.eq.s32.totalorder %s4048_s28, 1  ;;  %s2734_s22 = sshll.u32 %s3432_s21, 4  ;;  %s2735_s22 = int_to_ptr.vmem [resolvable:$true] %s2734_s22 }
0x1de0   : > { %s3362_s24 = scalar_lea.vmem %s2735_s22, 256  ;;  %p3369_p11 = scmp.lt.s32.totalorder %s2735_s22, %s2735_s22 }
0x1de1   : > { %p3363_p8 = scmp.ne.s32.totalorder %s2735_s22, %s3362_s24  ;;  %p3370_p12 = scmp.lt.s32.totalorder %s3362_s24, %s3362_s24 }
0x1de3   : > { %p3364_p9 = pnand %p3363_p8, %p4009_p7  ;;  %p3371_p13 = por %p3370_p12, %p3369_p11 }
0x1de5   : > { %p3365_p10 = pneg %p3364_p9 }
0x1de7   : > { %p3372_p0 = pnand %p3371_p13, %p3365_p10 }
0x1de9   : > { %3375 = shalt.err (!%p3372_p0)
}
0x1dea   : > { %s3433_s30 = smov 128   ;;  %s3434_s15 = smov 8  }
0x1deb   : > { %3260 = dma.vmem_to_hbm [thread:$0]  (%p4009_p7), %s2735_s22, 256, %s4042_s9, [#allocation5], %s3433_s30, %s3433_s30, %s3434_s15  }
0x1dec   : > { %3399 = dma.done.wait (%p4009_p7), [#allocation5], 256  }
0x1ded   : > { %3401 = vsyncadd (%p4009_p7), [#allocation5], 4294967040 }
0x1dee PF: > { %s20_s11 = sadd.s32 1, %s3412_s11   ;;  %s4050_s30 = smov %s3408_s10 }
0x1def   : > { %p17_p1 = scmp.ge.s32.totalorder %s20_s11, 4   ;;  %s4051_s10 = smov %s4053_s13 }
0x1df1   :  { %19 = sbr.rel (!%p17_p1) target bundleno = 4 (0x4), region = 113 }
0x1df6   :  { %2750 = vsyncpa [#allocation5], 1 }
0x1df7   :  { %2752 = vsyncpa [#allocation5 + $0x1], 1 }

</bundles_post_ra>
